<compile_context>
chip_gen: v5e
topology: v5e:2x2
jax: 0.10.0
libtpu: 0.0.40
codegen_flags: <defaults>
</compile_context>

<pallas_src>
import jax
import jax.numpy as jnp
import numpy as np
from jax import lax
from jax.experimental import pallas as pl
from jax.experimental.pallas import tpu as pltpu


# ------------------------- model dims (small, consistent with the module) ---
VOCAB = 50            # vocab_size
VOCAB_PAD = 128       # embedding table padded to one lane-tile for the one-hot dot
E = 32                # embedding_dim
H = 32                # hidden_dim
G = 4 * H             # gate lanes (128)
L = 2                 # n_layers
O = 4                 # output_size
T = 8                 # seq_length
B = 2                 # batch
BP = 8                # batch rows padded to the f32 sublane tile

# slab-A row layout (lane width = 4H = 128); every segment starts 8-row aligned
R_W0 = 0                      # rows   0..127 : table_pad @ Wih0^T + b0   (128, 128)
R_B1 = R_W0 + VOCAB_PAD       # row  128      : b_ih_l1 + b_hh_l1          (1, 128)
R_FCW = R_B1 + 8              # rows 136..167 : fc1 weight (H, O) zero-padded to 128 lanes
R_FCB = R_FCW + H             # row  168      : fc1 bias   (1, O) zero-padded
ROWS_A = R_FCB + 8            # 176


def sentiment_rnn_kernel(ids_ref,          # (T*BP, 1) int32, time-major, rows b>=B use id 0
                         h0_ref, c0_ref,   # (L, BP, H) padded initial hidden state
                         a_ref,            # (ROWS_A, 4H) packed slab (W0b / b1 / fcw / fcb)
                         w_ref,            # (2H, 8H) wavefront block weight [[Whh0,Wih1],[0,Whh1]]
                         out_ref,          # (B, O)
                         hn_ref, cn_ref,   # (L, B, H)
                         x0_s):            # VMEM (T*BP, 4H) layer-0 input projection
    f32 = jnp.float32

    # --- fused embedding lookup + layer-0 input projection (+ b0, folded into W0b rows)
    ids = ids_ref[...]                                                  # (T*BP, 1)
    lanes = lax.broadcasted_iota(jnp.int32, (T * BP, VOCAB_PAD), 1)
    onehot = (lanes == ids).astype(f32)                                 # (T*BP, VOCAB_PAD)
    x0_s[...] = jnp.dot(onehot, a_ref[R_W0:R_W0 + VOCAB_PAD, :],
                        preferred_element_type=f32)                     # (T*BP, 4H)

    wblk = w_ref[...]                                                   # (2H, 8H)
    b1 = jnp.broadcast_to(a_ref[R_B1:R_B1 + 1, :], (BP, G))             # hoisted broadcast

    h0 = h0_ref[0]                                                      # (BP, H)
    c0 = c0_ref[0]
    h1 = h0_ref[1]
    c1 = c0_ref[1]

    def gates_to_hc(gates, c):
        # PyTorch gate order i, f, g, o; sigmoid as exact tanh form (single EUP op)
        sig = 0.5 * jnp.tanh(0.5 * gates) + 0.5
        th = jnp.tanh(gates)
        i = sig[:, 0 * H:1 * H]
        f = sig[:, 1 * H:2 * H]
        g = th[:, 2 * H:3 * H]
        o = sig[:, 3 * H:4 * H]
        c_new = f * c + i * g
        return o * jnp.tanh(c_new), c_new

    # --- wavefront-fused 2-layer recurrence: T+1 super-steps, one MXU dot each ----
    # super-step s: layer-0 computes time s (needs h0_{s-1}), layer-1 computes time
    # s-1 (needs h0_{s-1} as input and h1_{s-2} recurrent)  ->  one fused dot:
    #   rec = [h0_{s-1} | h1_{s-2}] @ [[Whh0, Wih1],[0, Whh1]]
    for s in range(T + 1):
        rec = jnp.dot(jnp.concatenate([h0, h1], axis=1), wblk,
                      preferred_element_type=f32)                       # (BP, 8H)
        if s < T:        # layer 0, time step s
            g0 = x0_s[s * BP:(s + 1) * BP, :] + rec[:, :G]
            h0, c0 = gates_to_hc(g0, c0)
        if s >= 1:       # layer 1, time step s-1 (uses rec computed from old h0)
            g1 = rec[:, G:] + b1
            h1, c1 = gates_to_hc(g1, c1)

    # final hidden state tuple (h_n, c_n), PyTorch layout (L, B, H)
    hn_ref[0] = h0[:B, :]
    hn_ref[1] = h1[:B, :]
    cn_ref[0] = c0[:B, :]
    cn_ref[1] = c1[:B, :]

    # dropout(0.3) is identity in eval mode; fc1 + ReLU on the LAST time step
    # (== out.view(B, T, O)[:, -1] from the reference forward)
    fcw = a_ref[R_FCW:R_FCW + H, :]                                     # (H, 128) zero-padded
    fcb = a_ref[R_FCB:R_FCB + 1, :]                                     # (1, 128) zero-padded
    fc = jnp.dot(h1, fcw, preferred_element_type=f32) + fcb             # (BP, 128)
    out_ref[...] = jnp.maximum(fc, 0.0)[:B, :O].astype(out_ref.dtype)


def prepare_params(params):
    """One-time parameter preparation: fold / transpose / pad / pack into 2 slabs."""
    f32 = jnp.float32
    hi = lax.Precision.HIGHEST

    # embedding table padded to a full lane-tile along vocab.
    # NOTE: ids >= VOCAB silently map to a zero embedding (PyTorch would raise).
    table_p = jnp.zeros((VOCAB_PAD, E), f32).at[:VOCAB].set(params["embedding"])
    wih0 = params["w_ih_l0"].T                                   # (E, 4H)
    b0 = (params["b_ih_l0"] + params["b_hh_l0"])[None, :]        # (1, 4H)
    # fold embedding gather + layer-0 input projection + bias (onehot rows sum to 1)
    w0b = jnp.dot(table_p, wih0, precision=hi) + b0               # (VOCAB_PAD, 4H)

    whh0 = params["w_hh_l0"].T                                   # (H, 4H)
    wih1 = params["w_ih_l1"].T                                   # (H, 4H)
    whh1 = params["w_hh_l1"].T                                   # (H, 4H)
    b1 = (params["b_ih_l1"] + params["b_hh_l1"])[None, :]        # (1, 4H)
    fcw = params["fc1_w"].T                                      # (H, O)
    fcb = params["fc1_b"][None, :]                               # (1, O)

    # wavefront block weight [[Whh0, Wih1], [0, Whh1]] : (2H, 8H)
    wblk = jnp.block([[whh0, wih1],
                      [jnp.zeros((H, 4 * H), f32), whh1]])

    slab_a = jnp.zeros((ROWS_A, G), f32)
    slab_a = slab_a.at[R_W0:R_W0 + VOCAB_PAD, :].set(w0b)
    slab_a = slab_a.at[R_B1, :].set(b1[0])
    slab_a = slab_a.at[R_FCW:R_FCW + H, :O].set(fcw)
    slab_a = slab_a.at[R_FCB, :O].set(fcb[0])
    return {"slab_a": slab_a, "slab_b": wblk}


@jax.jit
def _forward_impl(x_ids, h0, c0, slab_a, slab_b):
    # time-major token ids, batch padded to 8 rows (pad rows use id 0, discarded later)
    ids_tm = jnp.pad(x_ids.astype(jnp.int32).T, ((0, 0), (0, BP - B))).reshape(T * BP, 1)
    # pad initial hidden state rows to the sublane tile so all per-step reads are aligned
    h0p = jnp.pad(h0, ((0, 0), (0, BP - B), (0, 0)))
    c0p = jnp.pad(c0, ((0, 0), (0, BP - B), (0, 0)))

    vmem = pl.BlockSpec(memory_space=pltpu.MemorySpace.VMEM)
    # TODO(synk): for batched inference on v7x, add a leading "parallel" grid axis over
    # independent sequences so the second TensorCore is used; at B=2 it is moot.
    out, h_n, c_n = pl.pallas_call(
        sentiment_rnn_kernel,
        out_shape=(
            jax.ShapeDtypeStruct((B, O), jnp.float32),
            jax.ShapeDtypeStruct((L, B, H), jnp.float32),
            jax.ShapeDtypeStruct((L, B, H), jnp.float32),
        ),
        in_specs=[vmem] * 5,
        out_specs=(vmem, vmem, vmem),
        scratch_shapes=[pltpu.VMEM((T * BP, G), jnp.float32)],   # layer-0 input projection
    )(ids_tm, h0p, c0p, slab_a, slab_b)
    return out, (h_n, c_n)


def sentiment_rnn_forward(x_ids, hidden, prepared):
    """x_ids: (B, T) token ids; hidden: (h0, c0) each (L, B, H); prepared: prepare_params()."""
    h0, c0 = hidden
    return _forward_impl(x_ids, h0, c0, prepared["slab_a"], prepared["slab_b"])


def init_params(key):
    ks = jax.random.split(key, 12)
    s = 0.1
    return {
        "embedding": jax.random.normal(ks[0], (VOCAB, E), jnp.float32) * s,
        "w_ih_l0": jax.random.normal(ks[1], (4 * H, E), jnp.float32) * s,
        "w_hh_l0": jax.random.normal(ks[2], (4 * H, H), jnp.float32) * s,
        "b_ih_l0": jax.random.normal(ks[3], (4 * H,), jnp.float32) * s,
        "b_hh_l0": jax.random.normal(ks[4], (4 * H,), jnp.float32) * s,
        "w_ih_l1": jax.random.normal(ks[5], (4 * H, H), jnp.float32) * s,
        "w_hh_l1": jax.random.normal(ks[6], (4 * H, H), jnp.float32) * s,
        "b_ih_l1": jax.random.normal(ks[7], (4 * H,), jnp.float32) * s,
        "b_hh_l1": jax.random.normal(ks[8], (4 * H,), jnp.float32) * s,
        "fc1_w": jax.random.normal(ks[9], (O, H), jnp.float32) * s,
        "fc1_b": jax.random.normal(ks[10], (O,), jnp.float32) * s,
        # fc2 exists in __init__ but is unused in forward; omitted on purpose.
    }


def reference_forward(x_ids, hidden, params):
    """Pure-JAX reference of the PyTorch forward (eval mode), for correctness check."""
    h, c = hidden
    emb = params["embedding"][x_ids]                    # (B, T, E)

    def layer(xseq, h, c, wih, whh, bih, bhh):
        outs = []
        for t in range(xseq.shape[1]):
            g = xseq[:, t] @ wih.T + bih + h @ whh.T + bhh
            i = jax.nn.sigmoid(g[:, 0 * H:1 * H])
            f = jax.nn.sigmoid(g[:, 1 * H:2 * H])
            gg = jnp.tanh(g[:, 2 * H:3 * H])
            o = jax.nn.sigmoid(g[:, 3 * H:4 * H])
            c = f * c + i * gg
            h = o * jnp.tanh(c)
            outs.append(h)
        return jnp.stack(outs, axis=1), h, c

    seq0, h0f, c0f = layer(emb, h[0], c[0], params["w_ih_l0"], params["w_hh_l0"],
                           params["b_ih_l0"], params["b_hh_l0"])
    seq1, h1f, c1f = layer(seq0, h[1], c[1], params["w_ih_l1"], params["w_hh_l1"],
                           params["b_ih_l1"], params["b_hh_l1"])
    out = jax.nn.relu(seq1[:, -1] @ params["fc1_w"].T + params["fc1_b"])
    return out, (jnp.stack([h0f, h1f]), jnp.stack([c0f, c1f]))


if __name__ == "__main__":
    key = jax.random.PRNGKey(0)
    k_param, k_x = jax.random.split(key)

    params = init_params(k_param)
    prepared = prepare_params(params)               # one-time weight packing

    x_ids = jax.random.randint(k_x, (B, T), 0, VOCAB, dtype=jnp.int32)
    # init_hidden: zeros of shape (n_layers, batch, hidden)
    h0 = jnp.zeros((L, B, H), jnp.float32)
    c0 = jnp.zeros((L, B, H), jnp.float32)

    out, (h_n, c_n) = sentiment_rnn_forward(x_ids, (h0, c0), prepared)
    jax.block_until_ready((out, h_n, c_n))

    assert out.shape == (B, O)
    assert h_n.shape == (L, B, H) and c_n.shape == (L, B, H)

    # correctness check vs pure-JAX reference (tanh-form sigmoid / fused dots -> tiny diffs)
    with jax.default_matmul_precision("highest"):
        out_r, (hn_r, cn_r) = reference_forward(x_ids, (h0, c0), params)
    np.testing.assert_allclose(np.asarray(out), np.asarray(out_r), rtol=5e-3, atol=5e-3)
    np.testing.assert_allclose(np.asarray(h_n), np.asarray(hn_r), rtol=5e-3, atol=5e-3)
    np.testing.assert_allclose(np.asarray(c_n), np.asarray(cn_r), rtol=5e-3, atol=5e-3)

    print("KERNEL_OK")
</pallas_src>

<mosaic_0001>
module attributes {stable_mosaic.version = 11 : i64} {
  func.func @sentiment_rnn_kernel(%arg0: memref<64x1xi32, #tpu.memory_space<vmem>>, %arg1: memref<2x8x32xf32, #tpu.memory_space<vmem>>, %arg2: memref<2x8x32xf32, #tpu.memory_space<vmem>>, %arg3: memref<176x128xf32, #tpu.memory_space<vmem>>, %arg4: memref<64x256xf32, #tpu.memory_space<vmem>>, %arg5: memref<2x4xf32, #tpu.memory_space<vmem>>, %arg6: memref<2x2x32xf32, #tpu.memory_space<vmem>>, %arg7: memref<2x2x32xf32, #tpu.memory_space<vmem>>, %arg8: memref<64x128xf32, #tpu.memory_space<vmem>>) attributes {dimension_semantics = [], scalar_prefetch = 0 : i64, scratch_operands = 1 : i64, tpu.core_type = #tpu.core_type<tc>} {
    %c0 = arith.constant 0 : index
    %c0_0 = arith.constant 0 : index
    %0 = vector.load %arg0[%c0, %c0_0] : memref<64x1xi32, #tpu.memory_space<vmem>>, vector<64x1xi32>
    %1 = tpu.iota {dimensions = array<i32: 1>} : vector<64x128xi32>
    %2 = vector.broadcast %0 : vector<64x1xi32> to vector<64x128xi32>
    %3 = arith.cmpi eq, %1, %2 : vector<64x128xi32>
    %4 = arith.extui %3 : vector<64x128xi1> to vector<64x128xi32>
    %5 = arith.sitofp %4 : vector<64x128xi32> to vector<64x128xf32>
    %c0_1 = arith.constant 0 : index
    %c0_2 = arith.constant 0 : index
    %6 = vector.load %arg3[%c0_1, %c0_2] : memref<176x128xf32, #tpu.memory_space<vmem>>, vector<128x128xf32>
    %cst = arith.constant dense<0.000000e+00> : vector<64x128xf32>
    %7 = tpu.matmul %5, %6, %cst {dimension_numbers = #tpu.dot_dimension_numbers<[1], [0], [0], [1], [0, 0, 1, 1], [], []>} : vector<64x128xf32>, vector<128x128xf32>, vector<64x128xf32> -> vector<64x128xf32>
    %c0_3 = arith.constant 0 : index
    %c0_4 = arith.constant 0 : index
    %8 = vector.load %arg8[%c0_3, %c0_4] : memref<64x128xf32, #tpu.memory_space<vmem>>, vector<64x128xf32>
    tpu.vector_store %arg8[%c0_3, %c0_4], %7 {strides = array<i32>} : memref<64x128xf32, #tpu.memory_space<vmem>>, vector<64x128xf32>,
    %c0_5 = arith.constant 0 : index
    %c0_6 = arith.constant 0 : index
    %9 = vector.load %arg4[%c0_5, %c0_6] : memref<64x256xf32, #tpu.memory_space<vmem>>, vector<64x256xf32>
    %c128 = arith.constant 128 : index
    %c0_7 = arith.constant 0 : index
    %10 = vector.load %arg3[%c128, %c0_7] : memref<176x128xf32, #tpu.memory_space<vmem>>, vector<1x128xf32>
    %11 = vector.shape_cast %10 : vector<1x128xf32> to vector<1x128xf32>
    %12 = vector.broadcast %11 : vector<1x128xf32> to vector<8x128xf32>
    %c0_8 = arith.constant 0 : index
    %c0_9 = arith.constant 0 : index
    %c0_10 = arith.constant 0 : index
    %13 = vector.load %arg1[%c0_8, %c0_9, %c0_10] : memref<2x8x32xf32, #tpu.memory_space<vmem>>, vector<1x8x32xf32>
    %14 = vector.shape_cast %13 : vector<1x8x32xf32> to vector<8x32xf32>
    %c0_11 = arith.constant 0 : index
    %c0_12 = arith.constant 0 : index
    %c0_13 = arith.constant 0 : index
    %15 = vector.load %arg2[%c0_11, %c0_12, %c0_13] : memref<2x8x32xf32, #tpu.memory_space<vmem>>, vector<1x8x32xf32>
    %16 = vector.shape_cast %15 : vector<1x8x32xf32> to vector<8x32xf32>
    %c1 = arith.constant 1 : index
    %c0_14 = arith.constant 0 : index
    %c0_15 = arith.constant 0 : index
    %17 = vector.load %arg1[%c1, %c0_14, %c0_15] : memref<2x8x32xf32, #tpu.memory_space<vmem>>, vector<1x8x32xf32>
    %18 = vector.shape_cast %17 : vector<1x8x32xf32> to vector<8x32xf32>
    %c1_16 = arith.constant 1 : index
    %c0_17 = arith.constant 0 : index
    %c0_18 = arith.constant 0 : index
    %19 = vector.load %arg2[%c1_16, %c0_17, %c0_18] : memref<2x8x32xf32, #tpu.memory_space<vmem>>, vector<1x8x32xf32>
    %20 = vector.shape_cast %19 : vector<1x8x32xf32> to vector<8x32xf32>
    %21 = tpu.concatenate %14, %18 in 1 : vector<8x32xf32>, vector<8x32xf32> -> vector<8x64xf32>
    %cst_19 = arith.constant dense<0.000000e+00> : vector<8x256xf32>
    %22 = tpu.matmul %21, %9, %cst_19 {dimension_numbers = #tpu.dot_dimension_numbers<[1], [0], [0], [1], [0, 0, 1, 1], [], []>} : vector<8x64xf32>, vector<64x256xf32>, vector<8x256xf32> -> vector<8x256xf32>
    %c0_20 = arith.constant 0 : index
    %c0_21 = arith.constant 0 : index
    %23 = vector.load %arg8[%c0_20, %c0_21] : memref<64x128xf32, #tpu.memory_space<vmem>>, vector<8x128xf32>
    %24 = vector.extract_strided_slice %22 {offsets = [0, 0], sizes = [8, 128], strides = [1, 1]} : vector<8x256xf32> to vector<8x128xf32>
    %25 = arith.addf %23, %24 : vector<8x128xf32>
    %cst_22 = arith.constant 5.000000e-01 : f32
    %26 = vector.broadcast %cst_22 : f32 to vector<8x128xf32>
    %27 = arith.mulf %26, %25 : vector<8x128xf32>
    %28 = math.tanh %27 : vector<8x128xf32>
    %cst_23 = arith.constant 5.000000e-01 : f32
    %29 = vector.broadcast %cst_23 : f32 to vector<8x128xf32>
    %30 = arith.mulf %29, %28 : vector<8x128xf32>
    %cst_24 = arith.constant 5.000000e-01 : f32
    %31 = vector.broadcast %cst_24 : f32 to vector<8x128xf32>
    %32 = arith.addf %30, %31 : vector<8x128xf32>
    %33 = math.tanh %25 : vector<8x128xf32>
    %34 = vector.extract_strided_slice %32 {offsets = [0, 0], sizes = [8, 32], strides = [1, 1]} : vector<8x128xf32> to vector<8x32xf32>
    %35 = vector.extract_strided_slice %32 {offsets = [0, 32], sizes = [8, 32], strides = [1, 1]} : vector<8x128xf32> to vector<8x32xf32>
    %36 = vector.extract_strided_slice %33 {offsets = [0, 64], sizes = [8, 32], strides = [1, 1]} : vector<8x128xf32> to vector<8x32xf32>
    %37 = vector.extract_strided_slice %32 {offsets = [0, 96], sizes = [8, 32], strides = [1, 1]} : vector<8x128xf32> to vector<8x32xf32>
    %38 = arith.mulf %35, %16 : vector<8x32xf32>
    %39 = arith.mulf %34, %36 : vector<8x32xf32>
    %40 = arith.addf %38, %39 : vector<8x32xf32>
    %41 = math.tanh %40 : vector<8x32xf32>
    %42 = arith.mulf %37, %41 : vector<8x32xf32>
    %43 = tpu.concatenate %42, %18 in 1 : vector<8x32xf32>, vector<8x32xf32> -> vector<8x64xf32>
    %cst_25 = arith.constant dense<0.000000e+00> : vector<8x256xf32>
    %44 = tpu.matmul %43, %9, %cst_25 {dimension_numbers = #tpu.dot_dimension_numbers<[1], [0], [0], [1], [0, 0, 1, 1], [], []>} : vector<8x64xf32>, vector<64x256xf32>, vector<8x256xf32> -> vector<8x256xf32>
    %c8 = arith.constant 8 : index
    %c0_26 = arith.constant 0 : index
    %45 = vector.load %arg8[%c8, %c0_26] : memref<64x128xf32, #tpu.memory_space<vmem>>, vector<8x128xf32>
    %46 = vector.extract_strided_slice %44 {offsets = [0, 0], sizes = [8, 128], strides = [1, 1]} : vector<8x256xf32> to vector<8x128xf32>
    %47 = arith.addf %45, %46 : vector<8x128xf32>
    %cst_27 = arith.constant 5.000000e-01 : f32
    %48 = vector.broadcast %cst_27 : f32 to vector<8x128xf32>
    %49 = arith.mulf %48, %47 : vector<8x128xf32>
    %50 = math.tanh %49 : vector<8x128xf32>
    %cst_28 = arith.constant 5.000000e-01 : f32
    %51 = vector.broadcast %cst_28 : f32 to vector<8x128xf32>
    %52 = arith.mulf %51, %50 : vector<8x128xf32>
    %cst_29 = arith.constant 5.000000e-01 : f32
    %53 = vector.broadcast %cst_29 : f32 to vector<8x128xf32>
    %54 = arith.addf %52, %53 : vector<8x128xf32>
    %55 = math.tanh %47 : vector<8x128xf32>
    %56 = vector.extract_strided_slice %54 {offsets = [0, 0], sizes = [8, 32], strides = [1, 1]} : vector<8x128xf32> to vector<8x32xf32>
    %57 = vector.extract_strided_slice %54 {offsets = [0, 32], sizes = [8, 32], strides = [1, 1]} : vector<8x128xf32> to vector<8x32xf32>
    %58 = vector.extract_strided_slice %55 {offsets = [0, 64], sizes = [8, 32], strides = [1, 1]} : vector<8x128xf32> to vector<8x32xf32>
    %59 = vector.extract_strided_slice %54 {offsets = [0, 96], sizes = [8, 32], strides = [1, 1]} : vector<8x128xf32> to vector<8x32xf32>
    %60 = arith.mulf %57, %40 : vector<8x32xf32>
    %61 = arith.mulf %56, %58 : vector<8x32xf32>
    %62 = arith.addf %60, %61 : vector<8x32xf32>
    %63 = math.tanh %62 : vector<8x32xf32>
    %64 = arith.mulf %59, %63 : vector<8x32xf32>
    %65 = vector.extract_strided_slice %44 {offsets = [0, 128], sizes = [8, 128], strides = [1, 1]} : vector<8x256xf32> to vector<8x128xf32>
    %66 = arith.addf %65, %12 : vector<8x128xf32>
    %cst_30 = arith.constant 5.000000e-01 : f32
    %67 = vector.broadcast %cst_30 : f32 to vector<8x128xf32>
    %68 = arith.mulf %67, %66 : vector<8x128xf32>
    %69 = math.tanh %68 : vector<8x128xf32>
    %cst_31 = arith.constant 5.000000e-01 : f32
    %70 = vector.broadcast %cst_31 : f32 to vector<8x128xf32>
    %71 = arith.mulf %70, %69 : vector<8x128xf32>
    %cst_32 = arith.constant 5.000000e-01 : f32
    %72 = vector.broadcast %cst_32 : f32 to vector<8x128xf32>
    %73 = arith.addf %71, %72 : vector<8x128xf32>
    %74 = math.tanh %66 : vector<8x128xf32>
    %75 = vector.extract_strided_slice %73 {offsets = [0, 0], sizes = [8, 32], strides = [1, 1]} : vector<8x128xf32> to vector<8x32xf32>
    %76 = vector.extract_strided_slice %73 {offsets = [0, 32], sizes = [8, 32], strides = [1, 1]} : vector<8x128xf32> to vector<8x32xf32>
    %77 = vector.extract_strided_slice %74 {offsets = [0, 64], sizes = [8, 32], strides = [1, 1]} : vector<8x128xf32> to vector<8x32xf32>
    %78 = vector.extract_strided_slice %73 {offsets = [0, 96], sizes = [8, 32], strides = [1, 1]} : vector<8x128xf32> to vector<8x32xf32>
    %79 = arith.mulf %76, %20 : vector<8x32xf32>
    %80 = arith.mulf %75, %77 : vector<8x32xf32>
    %81 = arith.addf %79, %80 : vector<8x32xf32>
    %82 = math.tanh %81 : vector<8x32xf32>
    %83 = arith.mulf %78, %82 : vector<8x32xf32>
    %84 = tpu.concatenate %64, %83 in 1 : vector<8x32xf32>, vector<8x32xf32> -> vector<8x64xf32>
    %cst_33 = arith.constant dense<0.000000e+00> : vector<8x256xf32>
    %85 = tpu.matmul %84, %9, %cst_33 {dimension_numbers = #tpu.dot_dimension_numbers<[1], [0], [0], [1], [0, 0, 1, 1], [], []>} : vector<8x64xf32>, vector<64x256xf32>, vector<8x256xf32> -> vector<8x256xf32>
    %c16 = arith.constant 16 : index
    %c0_34 = arith.constant 0 : index
    %86 = vector.load %arg8[%c16, %c0_34] : memref<64x128xf32, #tpu.memory_space<vmem>>, vector<8x128xf32>
    %87 = vector.extract_strided_slice %85 {offsets = [0, 0], sizes = [8, 128], strides = [1, 1]} : vector<8x256xf32> to vector<8x128xf32>
    %88 = arith.addf %86, %87 : vector<8x128xf32>
    %cst_35 = arith.constant 5.000000e-01 : f32
    %89 = vector.broadcast %cst_35 : f32 to vector<8x128xf32>
    %90 = arith.mulf %89, %88 : vector<8x128xf32>
    %91 = math.tanh %90 : vector<8x128xf32>
    %cst_36 = arith.constant 5.000000e-01 : f32
    %92 = vector.broadcast %cst_36 : f32 to vector<8x128xf32>
    %93 = arith.mulf %92, %91 : vector<8x128xf32>
    %cst_37 = arith.constant 5.000000e-01 : f32
    %94 = vector.broadcast %cst_37 : f32 to vector<8x128xf32>
    %95 = arith.addf %93, %94 : vector<8x128xf32>
    %96 = math.tanh %88 : vector<8x128xf32>
    %97 = vector.extract_strided_slice %95 {offsets = [0, 0], sizes = [8, 32], strides = [1, 1]} : vector<8x128xf32> to vector<8x32xf32>
    %98 = vector.extract_strided_slice %95 {offsets = [0, 32], sizes = [8, 32], strides = [1, 1]} : vector<8x128xf32> to vector<8x32xf32>
    %99 = vector.extract_strided_slice %96 {offsets = [0, 64], sizes = [8, 32], strides = [1, 1]} : vector<8x128xf32> to vector<8x32xf32>
    %100 = vector.extract_strided_slice %95 {offsets = [0, 96], sizes = [8, 32], strides = [1, 1]} : vector<8x128xf32> to vector<8x32xf32>
    %101 = arith.mulf %98, %62 : vector<8x32xf32>
    %102 = arith.mulf %97, %99 : vector<8x32xf32>
    %103 = arith.addf %101, %102 : vector<8x32xf32>
    %104 = math.tanh %103 : vector<8x32xf32>
    %105 = arith.mulf %100, %104 : vector<8x32xf32>
    %106 = vector.extract_strided_slice %85 {offsets = [0, 128], sizes = [8, 128], strides = [1, 1]} : vector<8x256xf32> to vector<8x128xf32>
    %107 = arith.addf %106, %12 : vector<8x128xf32>
    %cst_38 = arith.constant 5.000000e-01 : f32
    %108 = vector.broadcast %cst_38 : f32 to vector<8x128xf32>
    %109 = arith.mulf %108, %107 : vector<8x128xf32>
    %110 = math.tanh %109 : vector<8x128xf32>
    %cst_39 = arith.constant 5.000000e-01 : f32
    %111 = vector.broadcast %cst_39 : f32 to vector<8x128xf32>
    %112 = arith.mulf %111, %110 : vector<8x128xf32>
    %cst_40 = arith.constant 5.000000e-01 : f32
    %113 = vector.broadcast %cst_40 : f32 to vector<8x128xf32>
    %114 = arith.addf %112, %113 : vector<8x128xf32>
    %115 = math.tanh %107 : vector<8x128xf32>
    %116 = vector.extract_strided_slice %114 {offsets = [0, 0], sizes = [8, 32], strides = [1, 1]} : vector<8x128xf32> to vector<8x32xf32>
    %117 = vector.extract_strided_slice %114 {offsets = [0, 32], sizes = [8, 32], strides = [1, 1]} : vector<8x128xf32> to vector<8x32xf32>
    %118 = vector.extract_strided_slice %115 {offsets = [0, 64], sizes = [8, 32], strides = [1, 1]} : vector<8x128xf32> to vector<8x32xf32>
    %119 = vector.extract_strided_slice %114 {offsets = [0, 96], sizes = [8, 32], strides = [1, 1]} : vector<8x128xf32> to vector<8x32xf32>
    %120 = arith.mulf %117, %81 : vector<8x32xf32>
    %121 = arith.mulf %116, %118 : vector<8x32xf32>
    %122 = arith.addf %120, %121 : vector<8x32xf32>
    %123 = math.tanh %122 : vector<8x32xf32>
    %124 = arith.mulf %119, %123 : vector<8x32xf32>
    %125 = tpu.concatenate %105, %124 in 1 : vector<8x32xf32>, vector<8x32xf32> -> vector<8x64xf32>
    %cst_41 = arith.constant dense<0.000000e+00> : vector<8x256xf32>
    %126 = tpu.matmul %125, %9, %cst_41 {dimension_numbers = #tpu.dot_dimension_numbers<[1], [0], [0], [1], [0, 0, 1, 1], [], []>} : vector<8x64xf32>, vector<64x256xf32>, vector<8x256xf32> -> vector<8x256xf32>
    %c24 = arith.constant 24 : index
    %c0_42 = arith.constant 0 : index
    %127 = vector.load %arg8[%c24, %c0_42] : memref<64x128xf32, #tpu.memory_space<vmem>>, vector<8x128xf32>
    %128 = vector.extract_strided_slice %126 {offsets = [0, 0], sizes = [8, 128], strides = [1, 1]} : vector<8x256xf32> to vector<8x128xf32>
    %129 = arith.addf %127, %128 : vector<8x128xf32>
    %cst_43 = arith.constant 5.000000e-01 : f32
    %130 = vector.broadcast %cst_43 : f32 to vector<8x128xf32>
    %131 = arith.mulf %130, %129 : vector<8x128xf32>
    %132 = math.tanh %131 : vector<8x128xf32>
    %cst_44 = arith.constant 5.000000e-01 : f32
    %133 = vector.broadcast %cst_44 : f32 to vector<8x128xf32>
    %134 = arith.mulf %133, %132 : vector<8x128xf32>
    %cst_45 = arith.constant 5.000000e-01 : f32
    %135 = vector.broadcast %cst_45 : f32 to vector<8x128xf32>
    %136 = arith.addf %134, %135 : vector<8x128xf32>
    %137 = math.tanh %129 : vector<8x128xf32>
    %138 = vector.extract_strided_slice %136 {offsets = [0, 0], sizes = [8, 32], strides = [1, 1]} : vector<8x128xf32> to vector<8x32xf32>
    %139 = vector.extract_strided_slice %136 {offsets = [0, 32], sizes = [8, 32], strides = [1, 1]} : vector<8x128xf32> to vector<8x32xf32>
    %140 = vector.extract_strided_slice %137 {offsets = [0, 64], sizes = [8, 32], strides = [1, 1]} : vector<8x128xf32> to vector<8x32xf32>
    %141 = vector.extract_strided_slice %136 {offsets = [0, 96], sizes = [8, 32], strides = [1, 1]} : vector<8x128xf32> to vector<8x32xf32>
    %142 = arith.mulf %139, %103 : vector<8x32xf32>
    %143 = arith.mulf %138, %140 : vector<8x32xf32>
    %144 = arith.addf %142, %143 : vector<8x32xf32>
    %145 = math.tanh %144 : vector<8x32xf32>
    %146 = arith.mulf %141, %145 : vector<8x32xf32>
    %147 = vector.extract_strided_slice %126 {offsets = [0, 128], sizes = [8, 128], strides = [1, 1]} : vector<8x256xf32> to vector<8x128xf32>
    %148 = arith.addf %147, %12 : vector<8x128xf32>
    %cst_46 = arith.constant 5.000000e-01 : f32
    %149 = vector.broadcast %cst_46 : f32 to vector<8x128xf32>
    %150 = arith.mulf %149, %148 : vector<8x128xf32>
    %151 = math.tanh %150 : vector<8x128xf32>
    %cst_47 = arith.constant 5.000000e-01 : f32
    %152 = vector.broadcast %cst_47 : f32 to vector<8x128xf32>
    %153 = arith.mulf %152, %151 : vector<8x128xf32>
    %cst_48 = arith.constant 5.000000e-01 : f32
    %154 = vector.broadcast %cst_48 : f32 to vector<8x128xf32>
    %155 = arith.addf %153, %154 : vector<8x128xf32>
    %156 = math.tanh %148 : vector<8x128xf32>
    %157 = vector.extract_strided_slice %155 {offsets = [0, 0], sizes = [8, 32], strides = [1, 1]} : vector<8x128xf32> to vector<8x32xf32>
    %158 = vector.extract_strided_slice %155 {offsets = [0, 32], sizes = [8, 32], strides = [1, 1]} : vector<8x128xf32> to vector<8x32xf32>
    %159 = vector.extract_strided_slice %156 {offsets = [0, 64], sizes = [8, 32], strides = [1, 1]} : vector<8x128xf32> to vector<8x32xf32>
    %160 = vector.extract_strided_slice %155 {offsets = [0, 96], sizes = [8, 32], strides = [1, 1]} : vector<8x128xf32> to vector<8x32xf32>
    %161 = arith.mulf %158, %122 : vector<8x32xf32>
    %162 = arith.mulf %157, %159 : vector<8x32xf32>
    %163 = arith.addf %161, %162 : vector<8x32xf32>
    %164 = math.tanh %163 : vector<8x32xf32>
    %165 = arith.mulf %160, %164 : vector<8x32xf32>
    %166 = tpu.concatenate %146, %165 in 1 : vector<8x32xf32>, vector<8x32xf32> -> vector<8x64xf32>
    %cst_49 = arith.constant dense<0.000000e+00> : vector<8x256xf32>
    %167 = tpu.matmul %166, %9, %cst_49 {dimension_numbers = #tpu.dot_dimension_numbers<[1], [0], [0], [1], [0, 0, 1, 1], [], []>} : vector<8x64xf32>, vector<64x256xf32>, vector<8x256xf32> -> vector<8x256xf32>
    %c32 = arith.constant 32 : index
    %c0_50 = arith.constant 0 : index
    %168 = vector.load %arg8[%c32, %c0_50] : memref<64x128xf32, #tpu.memory_space<vmem>>, vector<8x128xf32>
    %169 = vector.extract_strided_slice %167 {offsets = [0, 0], sizes = [8, 128], strides = [1, 1]} : vector<8x256xf32> to vector<8x128xf32>
    %170 = arith.addf %168, %169 : vector<8x128xf32>
    %cst_51 = arith.constant 5.000000e-01 : f32
    %171 = vector.broadcast %cst_51 : f32 to vector<8x128xf32>
    %172 = arith.mulf %171, %170 : vector<8x128xf32>
    %173 = math.tanh %172 : vector<8x128xf32>
    %cst_52 = arith.constant 5.000000e-01 : f32
    %174 = vector.broadcast %cst_52 : f32 to vector<8x128xf32>
    %175 = arith.mulf %174, %173 : vector<8x128xf32>
    %cst_53 = arith.constant 5.000000e-01 : f32
    %176 = vector.broadcast %cst_53 : f32 to vector<8x128xf32>
    %177 = arith.addf %175, %176 : vector<8x128xf32>
    %178 = math.tanh %170 : vector<8x128xf32>
    %179 = vector.extract_strided_slice %177 {offsets = [0, 0], sizes = [8, 32], strides = [1, 1]} : vector<8x128xf32> to vector<8x32xf32>
    %180 = vector.extract_strided_slice %177 {offsets = [0, 32], sizes = [8, 32], strides = [1, 1]} : vector<8x128xf32> to vector<8x32xf32>
    %181 = vector.extract_strided_slice %178 {offsets = [0, 64], sizes = [8, 32], strides = [1, 1]} : vector<8x128xf32> to vector<8x32xf32>
    %182 = vector.extract_strided_slice %177 {offsets = [0, 96], sizes = [8, 32], strides = [1, 1]} : vector<8x128xf32> to vector<8x32xf32>
    %183 = arith.mulf %180, %144 : vector<8x32xf32>
    %184 = arith.mulf %179, %181 : vector<8x32xf32>
    %185 = arith.addf %183, %184 : vector<8x32xf32>
    %186 = math.tanh %185 : vector<8x32xf32>
    %187 = arith.mulf %182, %186 : vector<8x32xf32>
    %188 = vector.extract_strided_slice %167 {offsets = [0, 128], sizes = [8, 128], strides = [1, 1]} : vector<8x256xf32> to vector<8x128xf32>
    %189 = arith.addf %188, %12 : vector<8x128xf32>
    %cst_54 = arith.constant 5.000000e-01 : f32
    %190 = vector.broadcast %cst_54 : f32 to vector<8x128xf32>
    %191 = arith.mulf %190, %189 : vector<8x128xf32>
    %192 = math.tanh %191 : vector<8x128xf32>
    %cst_55 = arith.constant 5.000000e-01 : f32
    %193 = vector.broadcast %cst_55 : f32 to vector<8x128xf32>
    %194 = arith.mulf %193, %192 : vector<8x128xf32>
    %cst_56 = arith.constant 5.000000e-01 : f32
    %195 = vector.broadcast %cst_56 : f32 to vector<8x128xf32>
    %196 = arith.addf %194, %195 : vector<8x128xf32>
    %197 = math.tanh %189 : vector<8x128xf32>
    %198 = vector.extract_strided_slice %196 {offsets = [0, 0], sizes = [8, 32], strides = [1, 1]} : vector<8x128xf32> to vector<8x32xf32>
    %199 = vector.extract_strided_slice %196 {offsets = [0, 32], sizes = [8, 32], strides = [1, 1]} : vector<8x128xf32> to vector<8x32xf32>
    %200 = vector.extract_strided_slice %197 {offsets = [0, 64], sizes = [8, 32], strides = [1, 1]} : vector<8x128xf32> to vector<8x32xf32>
    %201 = vector.extract_strided_slice %196 {offsets = [0, 96], sizes = [8, 32], strides = [1, 1]} : vector<8x128xf32> to vector<8x32xf32>
    %202 = arith.mulf %199, %163 : vector<8x32xf32>
    %203 = arith.mulf %198, %200 : vector<8x32xf32>
    %204 = arith.addf %202, %203 : vector<8x32xf32>
    %205 = math.tanh %204 : vector<8x32xf32>
    %206 = arith.mulf %201, %205 : vector<8x32xf32>
    %207 = tpu.concatenate %187, %206 in 1 : vector<8x32xf32>, vector<8x32xf32> -> vector<8x64xf32>
    %cst_57 = arith.constant dense<0.000000e+00> : vector<8x256xf32>
    %208 = tpu.matmul %207, %9, %cst_57 {dimension_numbers = #tpu.dot_dimension_numbers<[1], [0], [0], [1], [0, 0, 1, 1], [], []>} : vector<8x64xf32>, vector<64x256xf32>, vector<8x256xf32> -> vector<8x256xf32>
    %c40 = arith.constant 40 : index
    %c0_58 = arith.constant 0 : index
    %209 = vector.load %arg8[%c40, %c0_58] : memref<64x128xf32, #tpu.memory_space<vmem>>, vector<8x128xf32>
    %210 = vector.extract_strided_slice %208 {offsets = [0, 0], sizes = [8, 128], strides = [1, 1]} : vector<8x256xf32> to vector<8x128xf32>
    %211 = arith.addf %209, %210 : vector<8x128xf32>
    %cst_59 = arith.constant 5.000000e-01 : f32
    %212 = vector.broadcast %cst_59 : f32 to vector<8x128xf32>
    %213 = arith.mulf %212, %211 : vector<8x128xf32>
    %214 = math.tanh %213 : vector<8x128xf32>
    %cst_60 = arith.constant 5.000000e-01 : f32
    %215 = vector.broadcast %cst_60 : f32 to vector<8x128xf32>
    %216 = arith.mulf %215, %214 : vector<8x128xf32>
    %cst_61 = arith.constant 5.000000e-01 : f32
    %217 = vector.broadcast %cst_61 : f32 to vector<8x128xf32>
    %218 = arith.addf %216, %217 : vector<8x128xf32>
    %219 = math.tanh %211 : vector<8x128xf32>
    %220 = vector.extract_strided_slice %218 {offsets = [0, 0], sizes = [8, 32], strides = [1, 1]} : vector<8x128xf32> to vector<8x32xf32>
    %221 = vector.extract_strided_slice %218 {offsets = [0, 32], sizes = [8, 32], strides = [1, 1]} : vector<8x128xf32> to vector<8x32xf32>
    %222 = vector.extract_strided_slice %219 {offsets = [0, 64], sizes = [8, 32], strides = [1, 1]} : vector<8x128xf32> to vector<8x32xf32>
    %223 = vector.extract_strided_slice %218 {offsets = [0, 96], sizes = [8, 32], strides = [1, 1]} : vector<8x128xf32> to vector<8x32xf32>
    %224 = arith.mulf %221, %185 : vector<8x32xf32>
    %225 = arith.mulf %220, %222 : vector<8x32xf32>
    %226 = arith.addf %224, %225 : vector<8x32xf32>
    %227 = math.tanh %226 : vector<8x32xf32>
    %228 = arith.mulf %223, %227 : vector<8x32xf32>
    %229 = vector.extract_strided_slice %208 {offsets = [0, 128], sizes = [8, 128], strides = [1, 1]} : vector<8x256xf32> to vector<8x128xf32>
    %230 = arith.addf %229, %12 : vector<8x128xf32>
    %cst_62 = arith.constant 5.000000e-01 : f32
    %231 = vector.broadcast %cst_62 : f32 to vector<8x128xf32>
    %232 = arith.mulf %231, %230 : vector<8x128xf32>
    %233 = math.tanh %232 : vector<8x128xf32>
    %cst_63 = arith.constant 5.000000e-01 : f32
    %234 = vector.broadcast %cst_63 : f32 to vector<8x128xf32>
    %235 = arith.mulf %234, %233 : vector<8x128xf32>
    %cst_64 = arith.constant 5.000000e-01 : f32
    %236 = vector.broadcast %cst_64 : f32 to vector<8x128xf32>
    %237 = arith.addf %235, %236 : vector<8x128xf32>
    %238 = math.tanh %230 : vector<8x128xf32>
    %239 = vector.extract_strided_slice %237 {offsets = [0, 0], sizes = [8, 32], strides = [1, 1]} : vector<8x128xf32> to vector<8x32xf32>
    %240 = vector.extract_strided_slice %237 {offsets = [0, 32], sizes = [8, 32], strides = [1, 1]} : vector<8x128xf32> to vector<8x32xf32>
    %241 = vector.extract_strided_slice %238 {offsets = [0, 64], sizes = [8, 32], strides = [1, 1]} : vector<8x128xf32> to vector<8x32xf32>
    %242 = vector.extract_strided_slice %237 {offsets = [0, 96], sizes = [8, 32], strides = [1, 1]} : vector<8x128xf32> to vector<8x32xf32>
    %243 = arith.mulf %240, %204 : vector<8x32xf32>
    %244 = arith.mulf %239, %241 : vector<8x32xf32>
    %245 = arith.addf %243, %244 : vector<8x32xf32>
    %246 = math.tanh %245 : vector<8x32xf32>
    %247 = arith.mulf %242, %246 : vector<8x32xf32>
    %248 = tpu.concatenate %228, %247 in 1 : vector<8x32xf32>, vector<8x32xf32> -> vector<8x64xf32>
    %cst_65 = arith.constant dense<0.000000e+00> : vector<8x256xf32>
    %249 = tpu.matmul %248, %9, %cst_65 {dimension_numbers = #tpu.dot_dimension_numbers<[1], [0], [0], [1], [0, 0, 1, 1], [], []>} : vector<8x64xf32>, vector<64x256xf32>, vector<8x256xf32> -> vector<8x256xf32>
    %c48 = arith.constant 48 : index
    %c0_66 = arith.constant 0 : index
    %250 = vector.load %arg8[%c48, %c0_66] : memref<64x128xf32, #tpu.memory_space<vmem>>, vector<8x128xf32>
    %251 = vector.extract_strided_slice %249 {offsets = [0, 0], sizes = [8, 128], strides = [1, 1]} : vector<8x256xf32> to vector<8x128xf32>
    %252 = arith.addf %250, %251 : vector<8x128xf32>
    %cst_67 = arith.constant 5.000000e-01 : f32
    %253 = vector.broadcast %cst_67 : f32 to vector<8x128xf32>
    %254 = arith.mulf %253, %252 : vector<8x128xf32>
    %255 = math.tanh %254 : vector<8x128xf32>
    %cst_68 = arith.constant 5.000000e-01 : f32
    %256 = vector.broadcast %cst_68 : f32 to vector<8x128xf32>
    %257 = arith.mulf %256, %255 : vector<8x128xf32>
    %cst_69 = arith.constant 5.000000e-01 : f32
    %258 = vector.broadcast %cst_69 : f32 to vector<8x128xf32>
    %259 = arith.addf %257, %258 : vector<8x128xf32>
    %260 = math.tanh %252 : vector<8x128xf32>
    %261 = vector.extract_strided_slice %259 {offsets = [0, 0], sizes = [8, 32], strides = [1, 1]} : vector<8x128xf32> to vector<8x32xf32>
    %262 = vector.extract_strided_slice %259 {offsets = [0, 32], sizes = [8, 32], strides = [1, 1]} : vector<8x128xf32> to vector<8x32xf32>
    %263 = vector.extract_strided_slice %260 {offsets = [0, 64], sizes = [8, 32], strides = [1, 1]} : vector<8x128xf32> to vector<8x32xf32>
    %264 = vector.extract_strided_slice %259 {offsets = [0, 96], sizes = [8, 32], strides = [1, 1]} : vector<8x128xf32> to vector<8x32xf32>
    %265 = arith.mulf %262, %226 : vector<8x32xf32>
    %266 = arith.mulf %261, %263 : vector<8x32xf32>
    %267 = arith.addf %265, %266 : vector<8x32xf32>
    %268 = math.tanh %267 : vector<8x32xf32>
    %269 = arith.mulf %264, %268 : vector<8x32xf32>
    %270 = vector.extract_strided_slice %249 {offsets = [0, 128], sizes = [8, 128], strides = [1, 1]} : vector<8x256xf32> to vector<8x128xf32>
    %271 = arith.addf %270, %12 : vector<8x128xf32>
    %cst_70 = arith.constant 5.000000e-01 : f32
    %272 = vector.broadcast %cst_70 : f32 to vector<8x128xf32>
    %273 = arith.mulf %272, %271 : vector<8x128xf32>
    %274 = math.tanh %273 : vector<8x128xf32>
    %cst_71 = arith.constant 5.000000e-01 : f32
    %275 = vector.broadcast %cst_71 : f32 to vector<8x128xf32>
    %276 = arith.mulf %275, %274 : vector<8x128xf32>
    %cst_72 = arith.constant 5.000000e-01 : f32
    %277 = vector.broadcast %cst_72 : f32 to vector<8x128xf32>
    %278 = arith.addf %276, %277 : vector<8x128xf32>
    %279 = math.tanh %271 : vector<8x128xf32>
    %280 = vector.extract_strided_slice %278 {offsets = [0, 0], sizes = [8, 32], strides = [1, 1]} : vector<8x128xf32> to vector<8x32xf32>
    %281 = vector.extract_strided_slice %278 {offsets = [0, 32], sizes = [8, 32], strides = [1, 1]} : vector<8x128xf32> to vector<8x32xf32>
    %282 = vector.extract_strided_slice %279 {offsets = [0, 64], sizes = [8, 32], strides = [1, 1]} : vector<8x128xf32> to vector<8x32xf32>
    %283 = vector.extract_strided_slice %278 {offsets = [0, 96], sizes = [8, 32], strides = [1, 1]} : vector<8x128xf32> to vector<8x32xf32>
    %284 = arith.mulf %281, %245 : vector<8x32xf32>
    %285 = arith.mulf %280, %282 : vector<8x32xf32>
    %286 = arith.addf %284, %285 : vector<8x32xf32>
    %287 = math.tanh %286 : vector<8x32xf32>
    %288 = arith.mulf %283, %287 : vector<8x32xf32>
    %289 = tpu.concatenate %269, %288 in 1 : vector<8x32xf32>, vector<8x32xf32> -> vector<8x64xf32>
    %cst_73 = arith.constant dense<0.000000e+00> : vector<8x256xf32>
    %290 = tpu.matmul %289, %9, %cst_73 {dimension_numbers = #tpu.dot_dimension_numbers<[1], [0], [0], [1], [0, 0, 1, 1], [], []>} : vector<8x64xf32>, vector<64x256xf32>, vector<8x256xf32> -> vector<8x256xf32>
    %c56 = arith.constant 56 : index
    %c0_74 = arith.constant 0 : index
    %291 = vector.load %arg8[%c56, %c0_74] : memref<64x128xf32, #tpu.memory_space<vmem>>, vector<8x128xf32>
    %292 = vector.extract_strided_slice %290 {offsets = [0, 0], sizes = [8, 128], strides = [1, 1]} : vector<8x256xf32> to vector<8x128xf32>
    %293 = arith.addf %291, %292 : vector<8x128xf32>
    %cst_75 = arith.constant 5.000000e-01 : f32
    %294 = vector.broadcast %cst_75 : f32 to vector<8x128xf32>
    %295 = arith.mulf %294, %293 : vector<8x128xf32>
    %296 = math.tanh %295 : vector<8x128xf32>
    %cst_76 = arith.constant 5.000000e-01 : f32
    %297 = vector.broadcast %cst_76 : f32 to vector<8x128xf32>
    %298 = arith.mulf %297, %296 : vector<8x128xf32>
    %cst_77 = arith.constant 5.000000e-01 : f32
    %299 = vector.broadcast %cst_77 : f32 to vector<8x128xf32>
    %300 = arith.addf %298, %299 : vector<8x128xf32>
    %301 = math.tanh %293 : vector<8x128xf32>
    %302 = vector.extract_strided_slice %300 {offsets = [0, 0], sizes = [8, 32], strides = [1, 1]} : vector<8x128xf32> to vector<8x32xf32>
    %303 = vector.extract_strided_slice %300 {offsets = [0, 32], sizes = [8, 32], strides = [1, 1]} : vector<8x128xf32> to vector<8x32xf32>
    %304 = vector.extract_strided_slice %301 {offsets = [0, 64], sizes = [8, 32], strides = [1, 1]} : vector<8x128xf32> to vector<8x32xf32>
    %305 = vector.extract_strided_slice %300 {offsets = [0, 96], sizes = [8, 32], strides = [1, 1]} : vector<8x128xf32> to vector<8x32xf32>
    %306 = arith.mulf %303, %267 : vector<8x32xf32>
    %307 = arith.mulf %302, %304 : vector<8x32xf32>
    %308 = arith.addf %306, %307 : vector<8x32xf32>
    %309 = math.tanh %308 : vector<8x32xf32>
    %310 = arith.mulf %305, %309 : vector<8x32xf32>
    %311 = vector.extract_strided_slice %290 {offsets = [0, 128], sizes = [8, 128], strides = [1, 1]} : vector<8x256xf32> to vector<8x128xf32>
    %312 = arith.addf %311, %12 : vector<8x128xf32>
    %cst_78 = arith.constant 5.000000e-01 : f32
    %313 = vector.broadcast %cst_78 : f32 to vector<8x128xf32>
    %314 = arith.mulf %313, %312 : vector<8x128xf32>
    %315 = math.tanh %314 : vector<8x128xf32>
    %cst_79 = arith.constant 5.000000e-01 : f32
    %316 = vector.broadcast %cst_79 : f32 to vector<8x128xf32>
    %317 = arith.mulf %316, %315 : vector<8x128xf32>
    %cst_80 = arith.constant 5.000000e-01 : f32
    %318 = vector.broadcast %cst_80 : f32 to vector<8x128xf32>
    %319 = arith.addf %317, %318 : vector<8x128xf32>
    %320 = math.tanh %312 : vector<8x128xf32>
    %321 = vector.extract_strided_slice %319 {offsets = [0, 0], sizes = [8, 32], strides = [1, 1]} : vector<8x128xf32> to vector<8x32xf32>
    %322 = vector.extract_strided_slice %319 {offsets = [0, 32], sizes = [8, 32], strides = [1, 1]} : vector<8x128xf32> to vector<8x32xf32>
    %323 = vector.extract_strided_slice %320 {offsets = [0, 64], sizes = [8, 32], strides = [1, 1]} : vector<8x128xf32> to vector<8x32xf32>
    %324 = vector.extract_strided_slice %319 {offsets = [0, 96], sizes = [8, 32], strides = [1, 1]} : vector<8x128xf32> to vector<8x32xf32>
    %325 = arith.mulf %322, %286 : vector<8x32xf32>
    %326 = arith.mulf %321, %323 : vector<8x32xf32>
    %327 = arith.addf %325, %326 : vector<8x32xf32>
    %328 = math.tanh %327 : vector<8x32xf32>
    %329 = arith.mulf %324, %328 : vector<8x32xf32>
    %330 = tpu.concatenate %310, %329 in 1 : vector<8x32xf32>, vector<8x32xf32> -> vector<8x64xf32>
    %cst_81 = arith.constant dense<0.000000e+00> : vector<8x256xf32>
    %331 = tpu.matmul %330, %9, %cst_81 {dimension_numbers = #tpu.dot_dimension_numbers<[1], [0], [0], [1], [0, 0, 1, 1], [], []>} : vector<8x64xf32>, vector<64x256xf32>, vector<8x256xf32> -> vector<8x256xf32>
    %332 = vector.extract_strided_slice %331 {offsets = [0, 128], sizes = [8, 128], strides = [1, 1]} : vector<8x256xf32> to vector<8x128xf32>
    %333 = arith.addf %332, %12 : vector<8x128xf32>
    %cst_82 = arith.constant 5.000000e-01 : f32
    %334 = vector.broadcast %cst_82 : f32 to vector<8x128xf32>
    %335 = arith.mulf %334, %333 : vector<8x128xf32>
    %336 = math.tanh %335 : vector<8x128xf32>
    %cst_83 = arith.constant 5.000000e-01 : f32
    %337 = vector.broadcast %cst_83 : f32 to vector<8x128xf32>
    %338 = arith.mulf %337, %336 : vector<8x128xf32>
    %cst_84 = arith.constant 5.000000e-01 : f32
    %339 = vector.broadcast %cst_84 : f32 to vector<8x128xf32>
    %340 = arith.addf %338, %339 : vector<8x128xf32>
    %341 = math.tanh %333 : vector<8x128xf32>
    %342 = vector.extract_strided_slice %340 {offsets = [0, 0], sizes = [8, 32], strides = [1, 1]} : vector<8x128xf32> to vector<8x32xf32>
    %343 = vector.extract_strided_slice %340 {offsets = [0, 32], sizes = [8, 32], strides = [1, 1]} : vector<8x128xf32> to vector<8x32xf32>
    %344 = vector.extract_strided_slice %341 {offsets = [0, 64], sizes = [8, 32], strides = [1, 1]} : vector<8x128xf32> to vector<8x32xf32>
    %345 = vector.extract_strided_slice %340 {offsets = [0, 96], sizes = [8, 32], strides = [1, 1]} : vector<8x128xf32> to vector<8x32xf32>
    %346 = arith.mulf %343, %327 : vector<8x32xf32>
    %347 = arith.mulf %342, %344 : vector<8x32xf32>
    %348 = arith.addf %346, %347 : vector<8x32xf32>
    %349 = math.tanh %348 : vector<8x32xf32>
    %350 = arith.mulf %345, %349 : vector<8x32xf32>
    %351 = vector.extract_strided_slice %310 {offsets = [0, 0], sizes = [2, 32], strides = [1, 1]} : vector<8x32xf32> to vector<2x32xf32>
    %c0_85 = arith.constant 0 : index
    %c0_86 = arith.constant 0 : index
    %c0_87 = arith.constant 0 : index
    %352 = vector.load %arg6[%c0_85, %c0_86, %c0_87] : memref<2x2x32xf32, #tpu.memory_space<vmem>>, vector<1x2x32xf32>
    %353 = vector.shape_cast %352 : vector<1x2x32xf32> to vector<2x32xf32>
    %354 = vector.shape_cast %351 : vector<2x32xf32> to vector<1x2x32xf32>
    tpu.vector_store %arg6[%c0_85, %c0_86, %c0_87], %354 {strides = array<i32>} : memref<2x2x32xf32, #tpu.memory_space<vmem>>, vector<1x2x32xf32>,
    %355 = vector.extract_strided_slice %350 {offsets = [0, 0], sizes = [2, 32], strides = [1, 1]} : vector<8x32xf32> to vector<2x32xf32>
    %c1_88 = arith.constant 1 : index
    %c0_89 = arith.constant 0 : index
    %c0_90 = arith.constant 0 : index
    %356 = vector.load %arg6[%c1_88, %c0_89, %c0_90] : memref<2x2x32xf32, #tpu.memory_space<vmem>>, vector<1x2x32xf32>
    %357 = vector.shape_cast %356 : vector<1x2x32xf32> to vector<2x32xf32>
    %358 = vector.shape_cast %355 : vector<2x32xf32> to vector<1x2x32xf32>
    tpu.vector_store %arg6[%c1_88, %c0_89, %c0_90], %358 {strides = array<i32>} : memref<2x2x32xf32, #tpu.memory_space<vmem>>, vector<1x2x32xf32>,
    %359 = vector.extract_strided_slice %308 {offsets = [0, 0], sizes = [2, 32], strides = [1, 1]} : vector<8x32xf32> to vector<2x32xf32>
    %c0_91 = arith.constant 0 : index
    %c0_92 = arith.constant 0 : index
    %c0_93 = arith.constant 0 : index
    %360 = vector.load %arg7[%c0_91, %c0_92, %c0_93] : memref<2x2x32xf32, #tpu.memory_space<vmem>>, vector<1x2x32xf32>
    %361 = vector.shape_cast %360 : vector<1x2x32xf32> to vector<2x32xf32>
    %362 = vector.shape_cast %359 : vector<2x32xf32> to vector<1x2x32xf32>
    tpu.vector_store %arg7[%c0_91, %c0_92, %c0_93], %362 {strides = array<i32>} : memref<2x2x32xf32, #tpu.memory_space<vmem>>, vector<1x2x32xf32>,
    %363 = vector.extract_strided_slice %348 {offsets = [0, 0], sizes = [2, 32], strides = [1, 1]} : vector<8x32xf32> to vector<2x32xf32>
    %c1_94 = arith.constant 1 : index
    %c0_95 = arith.constant 0 : index
    %c0_96 = arith.constant 0 : index
    %364 = vector.load %arg7[%c1_94, %c0_95, %c0_96] : memref<2x2x32xf32, #tpu.memory_space<vmem>>, vector<1x2x32xf32>
    %365 = vector.shape_cast %364 : vector<1x2x32xf32> to vector<2x32xf32>
    %366 = vector.shape_cast %363 : vector<2x32xf32> to vector<1x2x32xf32>
    tpu.vector_store %arg7[%c1_94, %c0_95, %c0_96], %366 {strides = array<i32>} : memref<2x2x32xf32, #tpu.memory_space<vmem>>, vector<1x2x32xf32>,
    %c136 = arith.constant 136 : index
    %c0_97 = arith.constant 0 : index
    %367 = vector.load %arg3[%c136, %c0_97] : memref<176x128xf32, #tpu.memory_space<vmem>>, vector<32x128xf32>
    %c168 = arith.constant 168 : index
    %c0_98 = arith.constant 0 : index
    %368 = vector.load %arg3[%c168, %c0_98] : memref<176x128xf32, #tpu.memory_space<vmem>>, vector<1x128xf32>
    %cst_99 = arith.constant dense<0.000000e+00> : vector<8x128xf32>
    %369 = tpu.matmul %350, %367, %cst_99 {dimension_numbers = #tpu.dot_dimension_numbers<[1], [0], [0], [1], [0, 0, 1, 1], [], []>} : vector<8x32xf32>, vector<32x128xf32>, vector<8x128xf32> -> vector<8x128xf32>
    %370 = vector.broadcast %368 : vector<1x128xf32> to vector<8x128xf32>
    %371 = arith.addf %369, %370 : vector<8x128xf32>
    %cst_100 = arith.constant 0.000000e+00 : f32
    %372 = vector.broadcast %cst_100 : f32 to vector<8x128xf32>
    %373 = arith.maximumf %371, %372 : vector<8x128xf32>
    %374 = vector.extract_strided_slice %373 {offsets = [0, 0], sizes = [2, 4], strides = [1, 1]} : vector<8x128xf32> to vector<2x4xf32>
    %c0_101 = arith.constant 0 : index
    %c0_102 = arith.constant 0 : index
    %375 = vector.load %arg5[%c0_101, %c0_102] : memref<2x4xf32, #tpu.memory_space<vmem>>, vector<2x4xf32>
    tpu.vector_store %arg5[%c0_101, %c0_102], %374 {strides = array<i32>} : memref<2x4xf32, #tpu.memory_space<vmem>>, vector<2x4xf32>,
    return
  }
}

</mosaic_0001>

<bundles_post_ra>
// kernel: _forward_impl.1
= control target key start
LH: loop header
LB: loop body
LE: loop exit
PB: predicated region body
PF: predicated region fallthrough
CT: control target
= control target key end

     0   :  { %13 = vsyncpa [#allocation4], 0  ;;  %s1819_s0 = inlined_call_operand.vmem [shape: s32[64,1], index: 0, kind: input, shape index: {}]   ;;  %s1820_s1 = inlined_call_operand.vmem [shape: f32[2,8,32], index: 1, kind: input, shape index: {}]   ;;  %s1821_s2 = inlined_call_operand.vmem [shape: f32[2,8,32], index: 2, kind: input, shape index: {}]   ;;  %s1822_s3 = inlined_call_operand.hbm [shape: f32[176,128], index: 3, kind: input, shape index: {}]   ;;  %s1823_s4 = inlined_call_operand.hbm [shape: f32[64,256], index: 4, kind: input, shape index: {}]   ;;  %s1824_s5 = inlined_call_operand.hbm [shape: f32[2,4], index: 5, kind: output, shape index: {0}]   ;;  %s1825_s6 = inlined_call_operand.hbm [shape: f32[2,2,32], index: 6, kind: output, shape index: {1}]   ;;  %s1826_s7 = inlined_call_operand.hbm [shape: f32[2,2,32], index: 7, kind: output, shape index: {2}]  }
   0x1   :  { %14 = vsyncpa [#allocation7], 0 }
   0x2   :  { %15 = vsyncpa [#allocation5], 0 }
   0x3   :  { %16 = vsyncpa [#allocation10], 0  ;;  %s27_s26 = sshll.u32 %s1822_s3, 4  ;;  %s1392_s27 = smov [#allocation3]   ;;  %s28_s26 = int_to_ptr.hbm [resolvable:$true] %s27_s26 }
   0x4   :  { %s29_s28 = sshll.u32 %s1392_s27, 4  ;;  %s40_s8 = sshll.u32 %s1823_s4, 4  ;;  %s30_s28 = int_to_ptr.vmem [resolvable:$true] %s29_s28  ;;  %s41_s8 = int_to_ptr.hbm [resolvable:$true] %s40_s8 }
   0x5   :  { %s1393_s9 = smov 128   ;;  %s1394_s10 = smov 8  }
   0x6   :  { %35 = dma.hbm_to_vmem [thread:$0]  %s28_s26, 2816, %s30_s28, [#allocation4], %s1393_s9, %s1393_s9, %s1394_s10  }
   0x7   :  { %s1395_s11 = smov [#allocation6]   ;;  %s1396_s13 = smov 256  }
   0x8   :  { %s42_s12 = sshll.u32 %s1395_s11, 4  ;;  %s1397_s14 = smov 16   ;;  %s43_s12 = int_to_ptr.vmem [resolvable:$true] %s42_s12 }
   0x9   :  { %48 = dma.hbm_to_vmem [thread:$0]  %s41_s8, 2048, %s43_s12, [#allocation7], %s1396_s13, %s1396_s13, %s1397_s14  }
   0xa   :  { %1384 = dma.done.wait [#allocation4], 2816  }
   0xb   :  { %1385 = vsyncadd [#allocation4], 4294964480 }
   0xc   :  { %1386 = dma.done.wait [#allocation7], 2048  }
   0xd   :  { %1387 = vsyncadd [#allocation7], 4294965248  ;;  %v1398_v0 = vmov 0   ;;  %v57_v1 = vld [vmem:[%s1819_s0] sm:$0xff]  ;;  %v130_v2 = vld [vmem:[#allocation3 + $0x78] sm:$0xff]  ;;  %s1399_s17 = smov 32   ;;  %v65_v27 = vlaneseq }
   0xe   :  { %1163 = vset.pattern.permute.xlu0 %v1398_v0  ;;  %1164 = vset.pattern.permute.xlu1 %v1398_v0  ;;  %v129_v3 = vld [vmem:[#allocation3 + $0x70] sm:$0xff]  ;;  %v128_v4 = vld [vmem:[#allocation3 + $0x68] sm:$0xff]  ;;  %v127_v5 = vld [vmem:[#allocation3 + $0x60] sm:$0xff]  ;;  %v1400_v30 = vmov 1.0   ;;  %vm208_vm1 = vcmask 261120   ;;  %vm210_vm2 = vcmask 523264  }
   0xf   :  { %1165 = vset.pattern.permute.xlu2 %v1398_v0  ;;  %68 = vperm.xlu0 %1163, %v57_v1   ;;  %v1456_v6 = vld [vmem:[#allocation6 + $0x70] sm:$0xff]  ;;  %v1458_v7 = vld [vmem:[#allocation6 + $0x60] sm:$0xff]  ;;  %v1129_v8 = vld [vmem:[%s1820_s1 + $0x8] sm:$0xff]  ;;  %v1500_v28 = vand.u32 127, %v65_v27  ;;  %s1401_s20 = smov 64   ;;  %vm1010_vm10 = vcmask 254976  }
  0x10   :  { %131 = vmatpush.msra.mxu0 %v130_v2  ;;  %v126_v9 = vld [vmem:[#allocation3 + $0x58] sm:$0xff]  ;;  %222 = vmatpush.msra.mxu1 %v1456_v6  ;;  %v1465_v10 = vld [vmem:[#allocation6 + $0x50] sm:$0xff]  ;;  %v125_v11 = vld [vmem:[#allocation3 + $0x50] sm:$0xff]  ;;  %s1403_s14 = smov [#allocation9]   ;;  %s1077_s16 = sshll.u32 %s1825_s6, 4  ;;  %vm1058_vm11 = vcmask 25600   ;;  %s1078_s16 = int_to_ptr.hbm [resolvable:$true] %s1077_s16 }
  0x11   :  { %278 = vmatpush.msra.mxu2 %v1456_v6  ;;  %v124_v12 = vld [vmem:[#allocation3 + $0x48] sm:$0xff]  ;;  %v123_v13 = vld [vmem:[#allocation3 + $0x40] sm:$0xff]  ;;  %v122_v14 = vld [vmem:[#allocation3 + $0x38] sm:$0xff]  ;;  %s1075_s3 = sshll.u32 %s1403_s14, 4  ;;  %s1404_s18 = smov 2   ;;  %s1076_s3 = int_to_ptr.vmem [resolvable:$true] %s1075_s3 }
  0x12   :  { %132 = vmatpush.msra.mxu0 %v129_v3  ;;  %223 = vmatpush.msra.mxu1 %v1458_v7  ;;  %v121_v15 = vld [vmem:[#allocation3 + $0x30] sm:$0xff]  ;;  %v120_v16 = vld [vmem:[#allocation3 + $0x28] sm:$0xff]  ;;  %v119_v17 = vld [vmem:[#allocation3 + $0x20] sm:$0xff]  ;;  %s1090_s21 = sshll.u32 %s1826_s7, 4  ;;  %s1405_s22 = smov [#allocation11]   ;;  %s1091_s21 = int_to_ptr.hbm [resolvable:$true] %s1090_s21 }
  0x13   :  { %279 = vmatpush.msra.mxu2 %v1458_v7  ;;  %v118_v18 = vld [vmem:[#allocation3 + $0x18] sm:$0xff]  ;;  %v117_v19 = vld [vmem:[#allocation3 + $0x10] sm:$0xff]  ;;  %v116_v20 = vld [vmem:[#allocation3 + $0x8] sm:$0xff]  ;;  %s1406_s6 = smov [#allocation8]  }
  0x14   :  { %133 = vmatpush.msra.mxu0 %v128_v4  ;;  %224 = vmatpush.msra.mxu1 %v1465_v10  ;;  %v115_v21 = vld [vmem:[#allocation3] sm:$0xff]  ;;  %v1472_v22 = vld [vmem:[#allocation6 + $0x40] sm:$0xff]  ;;  %v58_v50 = vld [vmem:[%s1819_s0 + $0x8] sm:$0xff]  ;;  %s1065_s23 = sshll.u32 %s1406_s6, 4  ;;  %s1066_s23 = int_to_ptr.vmem [resolvable:$true] %s1065_s23 }
  0x15   :  { %280 = vmatpush.msra.mxu2 %v1465_v10  ;;  %v1475_v23 = vld [vmem:[#allocation6 + $0x30] sm:$0xff]  ;;  %v1477_v24 = vld [vmem:[#allocation6 + $0x20] sm:$0xff]  ;;  %v1525_v51 = vld [vmem:[#allocation6 + $0x78] sm:$0xff] }
  0x16   :  { %134 = vmatpush.msra.mxu0 %v127_v5  ;;  %225 = vmatpush.msra.mxu1 %v1472_v22  ;;  %v1481_v25 = vld [vmem:[#allocation6 + $0x10] sm:$0xff]  ;;  %v1487_v26 = vld [vmem:[#allocation6] sm:$0xff]  ;;  %v1527_v52 = vld [vmem:[#allocation6 + $0x68] sm:$0xff] }
  0x17   :  { %205 = vrot.lane.b32.xlu0 %v1129_v8, %s1399_s17  ;;  %281 = vmatpush.msra.mxu2 %v1472_v22  ;;  %v198_v31 = vld [vmem:[%s1820_s1] sm:$0xff]  ;;  %v1530_v53 = vld [vmem:[#allocation6 + $0x58] sm:$0xff]  ;;  %v1536_v54 = vld [vmem:[#allocation6 + $0x48] sm:$0xff]  ;;  %s1088_s1 = sshll.u32 %s1405_s22, 4  ;;  %s1089_s1 = int_to_ptr.vmem [resolvable:$true] %s1088_s1 }
  0x18   :  { %135 = vmatpush.msra.mxu0 %v126_v9  ;;  %226 = vmatpush.msra.mxu1 %v1475_v23  ;;  %v199_v38 = vld [vmem:[%s1821_s2] sm:$0xff]  ;;  %v1542_v55 = vld [vmem:[#allocation6 + $0x38] sm:$0xff]  ;;  %v1548_v56 = vld [vmem:[#allocation6 + $0x28] sm:$0xff] }
  0x19   :  { %282 = vmatpush.msra.mxu2 %v1475_v23  ;;  %298 = vmatpush.msra.mxu3 %v1525_v51  ;;  %v1554_v57 = vld [vmem:[#allocation6 + $0x18] sm:$0xff]  ;;  %v1568_v60 = vld [vmem:[#allocation6 + $0x8] sm:$0xff]  ;;  %v1608_v1 = vld [vmem:[#allocation3 + $0x80] ss:$0 sm:$0xff] }
  0x1a   :  { %136 = vmatpush.msra.mxu0 %v125_v11  ;;  %227 = vmatpush.msra.mxu1 %v1477_v24  ;;  %v1130_v62 = vld [vmem:[%s1821_s2 + $0x8] sm:$0xff]  ;;  %s1067_s2 = sshll.u32 %s1824_s5, 4  ;;  %s1068_s2 = int_to_ptr.hbm [resolvable:$true] %s1067_s2 }
  0x1b   :  { %283 = vmatpush.msra.mxu2 %v1477_v24  ;;  %299 = vmatpush.msra.mxu3 %v1527_v52 }
  0x1c   :  { %137 = vmatpush.msra.mxu0 %v124_v12  ;;  %228 = vmatpush.msra.mxu1 %v1481_v25 }
  0x1d   :  { %284 = vmatpush.msra.mxu2 %v1481_v25  ;;  %300 = vmatpush.msra.mxu3 %v1530_v53 }
  0x1e   :  { %138 = vmatpush.msra.mxu0 %v123_v13  ;;  %229 = vmatpush.msra.mxu1 %v1487_v26 }
  0x1f   :  { %285 = vmatpush.msra.mxu2 %v1487_v26  ;;  %301 = vmatpush.msra.mxu3 %v1536_v54 }
  0x20   :  { %139 = vmatpush.msra.mxu0 %v122_v14  ;;  %381 = vmatpush.msrb.mxu1 %v1456_v6 }
  0x21   :  { %401 = vmatpush.msrb.mxu2 %v1525_v51  ;;  %302 = vmatpush.msra.mxu3 %v1542_v55 }
  0x22   :  { %140 = vmatpush.msra.mxu0 %v121_v15  ;;  %382 = vmatpush.msrb.mxu1 %v1458_v7 }
  0x23   :  { %402 = vmatpush.msrb.mxu2 %v1527_v52  ;;  %303 = vmatpush.msra.mxu3 %v1548_v56 }
  0x24   :  { %141 = vmatpush.msra.mxu0 %v120_v16  ;;  %383 = vmatpush.msrb.mxu1 %v1465_v10 }
  0x25   :  { %403 = vmatpush.msrb.mxu2 %v1530_v53  ;;  %304 = vmatpush.msra.mxu3 %v1554_v57 }
  0x26   :  { %142 = vmatpush.msra.mxu0 %v119_v17  ;;  %384 = vmatpush.msrb.mxu1 %v1472_v22 }
  0x27   :  { %404 = vmatpush.msrb.mxu2 %v1536_v54  ;;  %305 = vmatpush.msra.mxu3 %v1568_v60 }
  0x28   :  { %143 = vmatpush.msra.mxu0 %v118_v18  ;;  %385 = vmatpush.msrb.mxu1 %v1475_v23 }
  0x29   :  { %405 = vmatpush.msrb.mxu2 %v1542_v55  ;;  %480 = vmatpush.msrb.mxu3 %v1456_v6 }
  0x2a   :  { %144 = vmatpush.msra.mxu0 %v117_v19  ;;  %386 = vmatpush.msrb.mxu1 %v1477_v24 }
  0x2b   :  { %406 = vmatpush.msrb.mxu2 %v1548_v56  ;;  %481 = vmatpush.msrb.mxu3 %v1458_v7 }
  0x2c   :  { %145 = vmatpush.msra.mxu0 %v116_v20  ;;  %387 = vmatpush.msrb.mxu1 %v1481_v25 }
  0x2d   :  { %407 = vmatpush.msrb.mxu2 %v1554_v57  ;;  %482 = vmatpush.msrb.mxu3 %v1465_v10 }
  0x2e   :  { %146 = vmatpush.msra.mxu0 %v115_v21  ;;  %388 = vmatpush.msrb.mxu1 %v1487_v26 }
  0x2f   :  { %408 = vmatpush.msrb.mxu2 %v1568_v60  ;;  %483 = vmatpush.msrb.mxu3 %v1472_v22 }
  0x30   :  { %975 = vmatpush.msrb.mxu0 %v1525_v51 }
  0x31   :  { %484 = vmatpush.msrb.mxu3 %v1475_v23 }
  0x32   :  { %976 = vmatpush.msrb.mxu0 %v1527_v52 }
  0x33   :  { %485 = vmatpush.msrb.mxu3 %v1477_v24 }
  0x34   :  { %977 = vmatpush.msrb.mxu0 %v1530_v53 }
  0x35   :  { %486 = vmatpush.msrb.mxu3 %v1481_v25 }
  0x36   :  { %978 = vmatpush.msrb.mxu0 %v1536_v54 }
  0x37   :  { %487 = vmatpush.msrb.mxu3 %v1487_v26 }
  0x38   :  { %979 = vmatpush.msrb.mxu0 %v1542_v55 }
  0x3a   :  { %980 = vmatpush.msrb.mxu0 %v1548_v56 }
  0x3c   :  { %981 = vmatpush.msrb.mxu0 %v1554_v57 }
  0x3e   :  { %982 = vmatpush.msrb.mxu0 %v1568_v60 }
  0x81   :  { %v69_v29 = vpop.permute.xlu0 %68 }
  0x82   :  { %vm91_vm0 = vcmp.eq.s32.totalorder %v1500_v28, %v69_v29 }
  0x83   :  { %1121 = vmatmul.msk.f32.vlgmr.msra.gmra.mxu0 %vm91_vm0, %v1400_v30 }
  0x89   :  { %v1507_v32 = vpop.permute.xlu0 %205 }
  0x8a   :  { %v209_v33 = vsel %vm208_vm1, %v198_v31, %v1507_v32 }
  0x8b   :  { %1131 = vmatmul.msk.f32.vlgmr.msra.gmra.mxu1 %vm210_vm2, %v209_v33 }
  0x8c   :  { %500 = vmatpush.msra.mxu1 %v1525_v51 }
  0x8e   :  { %501 = vmatpush.msra.mxu1 %v1527_v52 }
  0x90   :  { %502 = vmatpush.msra.mxu1 %v1530_v53 }
  0x92   :  { %503 = vmatpush.msra.mxu1 %v1536_v54 }
  0x94   :  { %504 = vmatpush.msra.mxu1 %v1542_v55 }
  0x96   :  { %505 = vmatpush.msra.mxu1 %v1548_v56 }
  0x98   :  { %506 = vmatpush.msra.mxu1 %v1554_v57 }
  0x9a   :  { %507 = vmatpush.msra.mxu1 %v1568_v60 }
 0x100   :  { %v148_v34 = vpop.f32.mrf.mxu0 }
 0x108   :  { %v231_v35 = vpop.f32.mrf.mxu1 }
 0x109   :  { %v235_v36 = vadd.f32 %v231_v35, %v148_v34 }
 0x10b   :  { %1168 = vtanh.f32 %v235_v36  ;;  %v236_v39 = vmul.f32 0.5, %v235_v36 }
 0x10d   :  { %1170 = vtanh.f32 %v236_v39 }
 0x111   :  { %v1169_v37 = vpop.eup %1168 }
 0x112   :  { %247 = vrot.lane.b32.xlu1 %v1169_v37, %s1401_s20 }
 0x113   :  { %v1171_v40 = vpop.eup %1170 }
 0x114   :  { %v238_v41 = vmul.f32 0.5, %v1171_v40  ;;  %v59_v40 = vld [vmem:[%s1819_s0 + $0x10] sm:$0xff] }
 0x116   :  { %v239_v42 = vadd.f32 0.5, %v238_v41 }
 0x11a   :  { %242 = vrot.lane.b32.xlu1 %v199_v38, %s1399_s17 }
 0x122   :  { %71 = vperm.xlu1 %1164, %v58_v50  }
 0x12a   :  { %341 = vrot.lane.b32.xlu1 %v1130_v62, %s1399_s17 }
 0x184   :  { %v248_v43 = vpop.permute.xlu1 %247 }
 0x185   :  { %v250_v44 = vmul.f32 %v248_v43, %v239_v42 }
 0x187   :  { %252 = vrot.lane.b32.xlu2 %v250_v44, %s1399_s17 }
 0x18c   :  { %v243_v45 = vpop.permute.xlu1 %242 }
 0x18d   :  { %v245_v46 = vmul.f32 %v243_v45, %v239_v42 }
 0x194   :  { %v72_v61 = vpop.permute.xlu1 %71 }
 0x195   :  { %vm92_vm3 = vcmp.eq.s32.totalorder %v1500_v28, %v72_v61 }
 0x196   :  { %1122 = vmatmul.msk.f32.gmra.mxu0 %vm92_vm3, %v1400_v30 }
 0x19c   :  { %v342_v35 = vpop.permute.xlu1 %341 }
 0x1e1   :  { %v253_v47 = vpop.permute.xlu2 %252 }
 0x1e2   :  { %v1518_v48 = vadd.f32 %v253_v47, %v245_v46 }
 0x1e4   :  { %1172 = vtanh.f32 %v1518_v48 }
 0x1ea   :  { %v1173_v49 = vpop.eup %1172 }
 0x1eb   :  { %258 = vrot.lane.b32.xlu2 %v1173_v49, %s1401_s20 }
 0x213   :  { %v151_v2 = vpop.f32.mrf.mxu0 }
 0x245   :  { %v259_v58 = vpop.permute.xlu2 %258 }
 0x246   :  { %v261_v59 = vmul.f32 %v259_v58, %v239_v42 }
 0x248   :  { %263 = vrot.lane.b32.xlu0 %v261_v59, %s1399_s17 }
 0x2ba   :  { %v264_v63 = vpop.permute.xlu0 %263 }
 0x2bb   :  { %v266_v0 = vsel %vm208_vm1, %v264_v63, %v1507_v32 }
 0x2bc   :  { %1132 = vmatmul.msk.f32.vlgmr.msra.gmra.mxu2 %vm210_vm2, %v266_v0  ;;  %1133 = vmatmul.msk.f32.vlgmr.msra.gmra.mxu3 %vm210_vm2, %v266_v0 }
 0x2bd   :  { %579 = vmatpush.msra.mxu2 %v1456_v6  ;;  %599 = vmatpush.msra.mxu3 %v1525_v51 }
 0x2bf   :  { %580 = vmatpush.msra.mxu2 %v1458_v7  ;;  %600 = vmatpush.msra.mxu3 %v1527_v52 }
 0x2c1   :  { %581 = vmatpush.msra.mxu2 %v1465_v10  ;;  %601 = vmatpush.msra.mxu3 %v1530_v53 }
 0x2c3   :  { %582 = vmatpush.msra.mxu2 %v1472_v22  ;;  %602 = vmatpush.msra.mxu3 %v1536_v54 }
 0x2c5   :  { %583 = vmatpush.msra.mxu2 %v1475_v23  ;;  %603 = vmatpush.msra.mxu3 %v1542_v55 }
 0x2c7   :  { %584 = vmatpush.msra.mxu2 %v1477_v24  ;;  %604 = vmatpush.msra.mxu3 %v1548_v56 }
 0x2c9   :  { %585 = vmatpush.msra.mxu2 %v1481_v25  ;;  %605 = vmatpush.msra.mxu3 %v1554_v57 }
 0x2cb   :  { %586 = vmatpush.msra.mxu2 %v1487_v26  ;;  %606 = vmatpush.msra.mxu3 %v1568_v60 }
 0x33f   :  { %v287_v3 = vpop.f32.mrf.mxu2  ;;  %v307_v4 = vpop.f32.mrf.mxu3 }
 0x340   :  { %v311_v5 = vadd.f32 %v287_v3, %v151_v2  ;;  %v334_v8 = vadd.f32 %v1608_v1, %v307_v4 }
 0x342   :  { %1174 = vtanh.f32 %v311_v5  ;;  %v312_v12 = vmul.f32 0.5, %v311_v5  ;;  %v335_v18 = vmul.f32 0.5, %v334_v8 }
 0x343   :  { %1176 = vtanh.f32 %v334_v8 }
 0x344   :  { %1178 = vtanh.f32 %v312_v12 }
 0x345   :  { %1180 = vtanh.f32 %v335_v18 }
 0x348   :  { %v1175_v9 = vpop.eup %1174 }
 0x349   :  { %v1177_v11 = vpop.eup %1176  ;;  %319 = vrot.lane.b32.xlu2 %v1175_v9, %s1401_s20 }
 0x34a   :  { %346 = vrot.lane.b32.xlu0 %v1177_v11, %s1401_s20  ;;  %v1179_v13 = vpop.eup %1178 }
 0x34b   :  { %v314_v14 = vmul.f32 0.5, %v1179_v13  ;;  %v1181_v19 = vpop.eup %1180 }
 0x34c   :  { %v337_v20 = vmul.f32 0.5, %v1181_v19 }
 0x34d   :  { %v315_v15 = vadd.f32 0.5, %v314_v14 }
 0x34e   :  { %v338_v21 = vadd.f32 0.5, %v337_v20 }
 0x34f   :  { %v317_v31 = vmul.f32 %v315_v15, %v1518_v48 }
 0x350   :  { %v344_v36 = vmul.f32 %v342_v35, %v338_v21 }
 0x3a3   :  { %v320_v16 = vpop.permute.xlu2 %319 }
 0x3a4   :  { %v322_v17 = vmul.f32 %v320_v16, %v315_v15 }
 0x3a6   :  { %324 = vrot.lane.b32.xlu2 %v322_v17, %s1399_s17 }
 0x3bc   :  { %v347_v27 = vpop.permute.xlu0 %346 }
 0x3bd   :  { %v349_v29 = vmul.f32 %v347_v27, %v338_v21 }
 0x3bf   :  { %351 = vrot.lane.b32.xlu0 %v349_v29, %s1399_s17 }
 0x400   :  { %v325_v32 = vpop.permute.xlu2 %324 }
 0x401   :  { %v1616_v33 = vadd.f32 %v325_v32, %v317_v31  ;;  %v60_v31 = vld [vmem:[%s1819_s0 + $0x18] sm:$0xff] }
 0x403   :  { %1182 = vtanh.f32 %v1616_v33 }
 0x409   :  { %v1183_v34 = vpop.eup %1182 }
 0x40a   :  { %330 = vrot.lane.b32.xlu1 %v1183_v34, %s1401_s20 }
 0x431   :  { %v352_v37 = vpop.permute.xlu0 %351 }
 0x432   :  { %v1620_v38 = vadd.f32 %v352_v37, %v344_v36 }
 0x434   :  { %1184 = vtanh.f32 %v1620_v38 }
 0x43a   :  { %v1185_v39 = vpop.eup %1184 }
 0x43b   :  { %357 = vrot.lane.b32.xlu2 %v1185_v39, %s1401_s20 }
 0x443   :  { %74 = vperm.xlu2 %1165, %v59_v40  }
 0x47c   :  { %v331_v41 = vpop.permute.xlu1 %330 }
 0x47d   :  { %v333_v42 = vmul.f32 %v331_v41, %v315_v15 }
 0x47f   :  { %362 = vrot.lane.b32.xlu0 %v333_v42, %s1399_s17 }
 0x495   :  { %v358_v43 = vpop.permute.xlu2 %357 }
 0x496   :  { %v360_v44 = vmul.f32 %v358_v43, %v338_v21 }
 0x498   :  { %366 = vrot.lane.b32.xlu1 %v360_v44, %s1401_s20 }
 0x49d   :  { %v75_v45 = vpop.permute.xlu2 %74 }
 0x49e   :  { %vm93_vm4 = vcmp.eq.s32.totalorder %v1500_v28, %v75_v45 }
 0x49f   :  { %1123 = vmatmul.msk.f32.gmra.mxu0 %vm93_vm4, %v1400_v30 }
 0x4f1   :  { %v363_v46 = vpop.permute.xlu0 %362 }
 0x50a   :  { %v367_v47 = vpop.permute.xlu1 %366 }
 0x50b   :  { %v369_v48 = vsel %vm208_vm1, %v363_v46, %v367_v47 }
 0x50c   :  { %1134 = vmatmul.msk.f32.vlgmr.msrb.gmra.mxu1 %vm210_vm2, %v369_v48  ;;  %1135 = vmatmul.msk.f32.vlgmr.msrb.gmra.mxu2 %vm210_vm2, %v369_v48 }
 0x50d   :  { %678 = vmatpush.msrb.mxu1 %v1456_v6  ;;  %698 = vmatpush.msrb.mxu2 %v1525_v51 }
 0x50f   :  { %679 = vmatpush.msrb.mxu1 %v1458_v7  ;;  %699 = vmatpush.msrb.mxu2 %v1527_v52 }
 0x511   :  { %680 = vmatpush.msrb.mxu1 %v1465_v10  ;;  %700 = vmatpush.msrb.mxu2 %v1530_v53 }
 0x513   :  { %681 = vmatpush.msrb.mxu1 %v1472_v22  ;;  %701 = vmatpush.msrb.mxu2 %v1536_v54 }
 0x515   :  { %682 = vmatpush.msrb.mxu1 %v1475_v23  ;;  %702 = vmatpush.msrb.mxu2 %v1542_v55 }
 0x517   :  { %683 = vmatpush.msrb.mxu1 %v1477_v24  ;;  %703 = vmatpush.msrb.mxu2 %v1548_v56 }
 0x519   :  { %684 = vmatpush.msrb.mxu1 %v1481_v25  ;;  %704 = vmatpush.msrb.mxu2 %v1554_v57 }
 0x51b   :  { %685 = vmatpush.msrb.mxu1 %v1487_v26  ;;  %705 = vmatpush.msrb.mxu2 %v1568_v60 }
 0x51c   :  { %v154_v49 = vpop.f32.mrf.mxu0 }
 0x589   :  { %v390_v50 = vpop.f32.mrf.mxu1 }
 0x58a   :  { %v414_v58 = vadd.f32 %v390_v50, %v154_v49 }
 0x58c   :  { %1186 = vtanh.f32 %v414_v58  ;;  %v415_v0 = vmul.f32 0.5, %v414_v58 }
 0x58f   :  { %v410_v59 = vpop.f32.mrf.mxu2 }
 0x590   :  { %v437_v61 = vadd.f32 %v1608_v1, %v410_v59 }
 0x592   :  { %v1187_v62 = vpop.eup %1186  ;;  %1188 = vtanh.f32 %v437_v61  ;;  %v438_v2 = vmul.f32 0.5, %v437_v61 }
 0x593   :  { %422 = vrot.lane.b32.xlu0 %v1187_v62, %s1401_s20  ;;  %1190 = vtanh.f32 %v415_v0 }
 0x594   :  { %1192 = vtanh.f32 %v438_v2 }
 0x598   :  { %v1189_v63 = vpop.eup %1188 }
 0x599   :  { %445 = vrot.lane.b32.xlu1 %v1189_v63, %s1401_s20  ;;  %v1191_v3 = vpop.eup %1190 }
 0x59a   :  { %v417_v4 = vmul.f32 0.5, %v1191_v3  ;;  %v1193_v5 = vpop.eup %1192 }
 0x59b   :  { %v440_v11 = vmul.f32 0.5, %v1193_v5 }
 0x59c   :  { %v418_v8 = vadd.f32 0.5, %v417_v4 }
 0x59d   :  { %v441_v13 = vadd.f32 0.5, %v440_v11 }
 0x59e   :  { %v420_v16 = vmul.f32 %v418_v8, %v1616_v33 }
 0x59f   :  { %v443_v20 = vmul.f32 %v441_v13, %v1620_v38 }
 0x605   :  { %v423_v9 = vpop.permute.xlu0 %422 }
 0x606   :  { %v425_v12 = vmul.f32 %v423_v9, %v418_v8 }
 0x608   :  { %427 = vrot.lane.b32.xlu2 %v425_v12, %s1399_s17 }
 0x60b   :  { %v446_v14 = vpop.permute.xlu1 %445 }
 0x60c   :  { %v448_v15 = vmul.f32 %v446_v14, %v441_v13 }
 0x60e   :  { %450 = vrot.lane.b32.xlu0 %v448_v15, %s1399_s17  ;;  %v61_v15 = vld [vmem:[%s1819_s0 + $0x20] sm:$0xff] }
 0x662   :  { %v428_v17 = vpop.permute.xlu2 %427 }
 0x663   :  { %v1656_v18 = vadd.f32 %v428_v17, %v420_v16 }
 0x665   :  { %1194 = vtanh.f32 %v1656_v18 }
 0x66b   :  { %v1195_v19 = vpop.eup %1194 }
 0x66c   :  { %433 = vrot.lane.b32.xlu1 %v1195_v19, %s1401_s20 }
 0x680   :  { %v451_v21 = vpop.permute.xlu0 %450 }
 0x681   :  { %v1661_v27 = vadd.f32 %v451_v21, %v443_v20 }
 0x683   :  { %1196 = vtanh.f32 %v1661_v27 }
 0x689   :  { %v1197_v29 = vpop.eup %1196 }
 0x68a   :  { %456 = vrot.lane.b32.xlu2 %v1197_v29, %s1401_s20 }
 0x692   :  { %77 = vperm.xlu2 %1165, %v60_v31  }
 0x6de   :  { %v434_v32 = vpop.permute.xlu1 %433 }
 0x6df   :  { %v436_v33 = vmul.f32 %v434_v32, %v418_v8 }
 0x6e1   :  { %461 = vrot.lane.b32.xlu0 %v436_v33, %s1399_s17 }
 0x6e4   :  { %v457_v34 = vpop.permute.xlu2 %456 }
 0x6e5   :  { %v459_v35 = vmul.f32 %v457_v34, %v441_v13 }
 0x6e7   :  { %465 = vrot.lane.b32.xlu1 %v459_v35, %s1401_s20 }
 0x6ec   :  { %v78_v36 = vpop.permute.xlu2 %77 }
 0x6ed   :  { %vm94_vm5 = vcmp.eq.s32.totalorder %v1500_v28, %v78_v36 }
 0x6ee   :  { %1124 = vmatmul.msk.f32.gmra.mxu0 %vm94_vm5, %v1400_v30 }
 0x753   :  { %v462_v37 = vpop.permute.xlu0 %461 }
 0x759   :  { %v466_v38 = vpop.permute.xlu1 %465 }
 0x75a   :  { %v468_v39 = vsel %vm208_vm1, %v462_v37, %v466_v38 }
 0x75b   :  { %1136 = vmatmul.msk.f32.vlgmr.msrb.gmra.mxu3 %vm210_vm2, %v468_v39  ;;  %1137 = vmatmul.msk.f32.vlgmr.msra.gmra.mxu1 %vm210_vm2, %v468_v39 }
 0x75c   :  { %777 = vmatpush.msrb.mxu3 %v1456_v6  ;;  %797 = vmatpush.msra.mxu1 %v1525_v51 }
 0x75e   :  { %778 = vmatpush.msrb.mxu3 %v1458_v7  ;;  %798 = vmatpush.msra.mxu1 %v1527_v52 }
 0x760   :  { %779 = vmatpush.msrb.mxu3 %v1465_v10  ;;  %799 = vmatpush.msra.mxu1 %v1530_v53 }
 0x762   :  { %780 = vmatpush.msrb.mxu3 %v1472_v22  ;;  %800 = vmatpush.msra.mxu1 %v1536_v54 }
 0x764   :  { %781 = vmatpush.msrb.mxu3 %v1475_v23  ;;  %801 = vmatpush.msra.mxu1 %v1542_v55 }
 0x766   :  { %782 = vmatpush.msrb.mxu3 %v1477_v24  ;;  %802 = vmatpush.msra.mxu1 %v1548_v56 }
 0x768   :  { %783 = vmatpush.msrb.mxu3 %v1481_v25  ;;  %803 = vmatpush.msra.mxu1 %v1554_v57 }
 0x76a   :  { %784 = vmatpush.msrb.mxu3 %v1487_v26  ;;  %804 = vmatpush.msra.mxu1 %v1568_v60 }
 0x76b   :  { %v157_v42 = vpop.f32.mrf.mxu0 }
 0x7d8   :  { %v509_v40 = vpop.f32.mrf.mxu1 }
 0x7d9   :  { %v536_v41 = vadd.f32 %v1608_v1, %v509_v40 }
 0x7db   :  { %1198 = vtanh.f32 %v536_v41  ;;  %v537_v47 = vmul.f32 0.5, %v536_v41 }
 0x7de   :  { %v489_v43 = vpop.f32.mrf.mxu3 }
 0x7df   :  { %v513_v44 = vadd.f32 %v489_v43, %v157_v42  ;;  %v62_v42 = vld [vmem:[%s1819_s0 + $0x28] sm:$0xff] }
 0x7e1   :  { %v1199_v45 = vpop.eup %1198  ;;  %1200 = vtanh.f32 %v513_v44  ;;  %v514_v48 = vmul.f32 0.5, %v513_v44 }
 0x7e2   :  { %544 = vrot.lane.b32.xlu1 %v1199_v45, %s1401_s20  ;;  %1202 = vtanh.f32 %v537_v47 }
 0x7e3   :  { %1204 = vtanh.f32 %v514_v48 }
 0x7e7   :  { %v1201_v46 = vpop.eup %1200 }
 0x7e8   :  { %521 = vrot.lane.b32.xlu0 %v1201_v46, %s1401_s20  ;;  %v1203_v49 = vpop.eup %1202 }
 0x7e9   :  { %v539_v50 = vmul.f32 0.5, %v1203_v49  ;;  %v1205_v58 = vpop.eup %1204 }
 0x7ea   :  { %v516_v62 = vmul.f32 0.5, %v1205_v58 }
 0x7eb   :  { %v540_v59 = vadd.f32 0.5, %v539_v50 }
 0x7ec   :  { %v517_v0 = vadd.f32 0.5, %v516_v62 }
 0x7ed   :  { %v542_v11 = vmul.f32 %v540_v59, %v1661_v27 }
 0x7ee   :  { %v519_v4 = vmul.f32 %v517_v0, %v1656_v18 }
 0x854   :  { %v545_v61 = vpop.permute.xlu1 %544 }
 0x855   :  { %v547_v63 = vmul.f32 %v545_v61, %v540_v59 }
 0x857   :  { %549 = vrot.lane.b32.xlu0 %v547_v63, %s1399_s17 }
 0x85a   :  { %v522_v2 = vpop.permute.xlu0 %521 }
 0x85b   :  { %v524_v3 = vmul.f32 %v522_v2, %v517_v0 }
 0x85d   :  { %526 = vrot.lane.b32.xlu2 %v524_v3, %s1399_s17 }
 0x8b7   :  { %v527_v5 = vpop.permute.xlu2 %526 }
 0x8b8   :  { %v1697_v8 = vadd.f32 %v527_v5, %v519_v4 }
 0x8ba   :  { %1206 = vtanh.f32 %v1697_v8 }
 0x8c0   :  { %v1207_v9 = vpop.eup %1206 }
 0x8c1   :  { %532 = vrot.lane.b32.xlu1 %v1207_v9, %s1401_s20 }
 0x8c9   :  { %v550_v12 = vpop.permute.xlu0 %549 }
 0x8ca   :  { %v1702_v13 = vadd.f32 %v550_v12, %v542_v11 }
 0x8cc   :  { %1208 = vtanh.f32 %v1702_v13 }
 0x8d2   :  { %v1209_v14 = vpop.eup %1208 }
 0x8d3   :  { %555 = vrot.lane.b32.xlu2 %v1209_v14, %s1401_s20 }
 0x8db   :  { %80 = vperm.xlu2 %1165, %v61_v15  }
 0x92d   :  { %v556_v16 = vpop.permute.xlu2 %555 }
 0x92e   :  { %v558_v17 = vmul.f32 %v556_v16, %v540_v59 }
 0x930   :  { %564 = vrot.lane.b32.xlu1 %v558_v17, %s1401_s20 }
 0x933   :  { %v533_v18 = vpop.permute.xlu1 %532 }
 0x934   :  { %v535_v19 = vmul.f32 %v533_v18, %v517_v0 }
 0x935   :  { %v81_v20 = vpop.permute.xlu2 %80 }
 0x936   :  { %vm95_vm6 = vcmp.eq.s32.totalorder %v1500_v28, %v81_v20  ;;  %560 = vrot.lane.b32.xlu0 %v535_v19, %s1399_s17 }
 0x937   :  { %1125 = vmatmul.msk.f32.gmra.mxu0 %vm95_vm6, %v1400_v30 }
 0x9a2   :  { %v565_v21 = vpop.permute.xlu1 %564 }
 0x9a8   :  { %v561_v27 = vpop.permute.xlu0 %560 }
 0x9a9   :  { %v567_v29 = vsel %vm208_vm1, %v561_v27, %v565_v21 }
 0x9aa   :  { %1138 = vmatmul.msk.f32.vlgmr.msra.gmra.mxu2 %vm210_vm2, %v567_v29  ;;  %1139 = vmatmul.msk.f32.vlgmr.msra.gmra.mxu3 %vm210_vm2, %v567_v29 }
 0x9ab   :  { %876 = vmatpush.msra.mxu2 %v1456_v6  ;;  %896 = vmatpush.msra.mxu3 %v1525_v51 }
 0x9ad   :  { %877 = vmatpush.msra.mxu2 %v1458_v7  ;;  %897 = vmatpush.msra.mxu3 %v1527_v52 }
 0x9af   :  { %878 = vmatpush.msra.mxu2 %v1465_v10  ;;  %898 = vmatpush.msra.mxu3 %v1530_v53 }
 0x9b1   :  { %879 = vmatpush.msra.mxu2 %v1472_v22  ;;  %899 = vmatpush.msra.mxu3 %v1536_v54 }
 0x9b3   :  { %880 = vmatpush.msra.mxu2 %v1475_v23  ;;  %900 = vmatpush.msra.mxu3 %v1542_v55 }
 0x9b4   :  { %v160_v6 = vpop.f32.mrf.mxu0 }
 0x9b5   :  { %881 = vmatpush.msra.mxu2 %v1477_v24  ;;  %901 = vmatpush.msra.mxu3 %v1548_v56 }
 0x9b7   :  { %882 = vmatpush.msra.mxu2 %v1481_v25  ;;  %902 = vmatpush.msra.mxu3 %v1554_v57 }
 0x9b9   :  { %883 = vmatpush.msra.mxu2 %v1487_v26  ;;  %903 = vmatpush.msra.mxu3 %v1568_v60 }
 0xa2d   :  { %v588_v7 = vpop.f32.mrf.mxu2  ;;  %v608_v10 = vpop.f32.mrf.mxu3 }
 0xa2e   :  { %v612_v22 = vadd.f32 %v588_v7, %v160_v6  ;;  %v635_v23 = vadd.f32 %v1608_v1, %v608_v10  ;;  %v63_v10 = vld [vmem:[%s1819_s0 + $0x30] sm:$0xff] }
 0xa30   :  { %1210 = vtanh.f32 %v612_v22  ;;  %v613_v25 = vmul.f32 0.5, %v612_v22  ;;  %v636_v52 = vmul.f32 0.5, %v635_v23 }
 0xa31   :  { %1212 = vtanh.f32 %v635_v23 }
 0xa32   :  { %1214 = vtanh.f32 %v613_v25 }
 0xa33   :  { %1216 = vtanh.f32 %v636_v52 }
 0xa36   :  { %v1211_v51 = vpop.eup %1210 }
 0xa37   :  { %v1213_v24 = vpop.eup %1212  ;;  %620 = vrot.lane.b32.xlu0 %v1211_v51, %s1401_s20 }
 0xa38   :  { %643 = vrot.lane.b32.xlu1 %v1213_v24, %s1401_s20  ;;  %v1215_v26 = vpop.eup %1214 }
 0xa39   :  { %v1217_v53 = vpop.eup %1216  ;;  %v615_v54 = vmul.f32 0.5, %v1215_v26 }
 0xa3a   :  { %v638_v55 = vmul.f32 0.5, %v1217_v53 }
 0xa3b   :  { %v616_v56 = vadd.f32 0.5, %v615_v54 }
 0xa3c   :  { %v639_v57 = vadd.f32 0.5, %v638_v55 }
 0xa3d   :  { %v618_v34 = vmul.f32 %v616_v56, %v1697_v8 }
 0xa3e   :  { %v641_v38 = vmul.f32 %v639_v57, %v1702_v13 }
 0xaa9   :  { %v621_v60 = vpop.permute.xlu0 %620 }
 0xaaa   :  { %v644_v31 = vpop.permute.xlu1 %643  ;;  %v623_v32 = vmul.f32 %v621_v60, %v616_v56 }
 0xaab   :  { %v646_v33 = vmul.f32 %v644_v31, %v639_v57 }
 0xaac   :  { %625 = vrot.lane.b32.xlu2 %v623_v32, %s1399_s17 }
 0xaad   :  { %648 = vrot.lane.b32.xlu0 %v646_v33, %s1399_s17 }
 0xb06   :  { %v626_v35 = vpop.permute.xlu2 %625 }
 0xb07   :  { %v628_v36 = vadd.f32 %v626_v35, %v618_v34 }
 0xb09   :  { %1218 = vtanh.f32 %v628_v36 }
 0xb0f   :  { %v1219_v37 = vpop.eup %1218 }
 0xb10   :  { %631 = vrot.lane.b32.xlu1 %v1219_v37, %s1401_s20 }
 0xb1f   :  { %v649_v39 = vpop.permute.xlu0 %648 }
 0xb20   :  { %v651_v40 = vadd.f32 %v649_v39, %v641_v38 }
 0xb22   :  { %1220 = vtanh.f32 %v651_v40 }
 0xb28   :  { %v1221_v41 = vpop.eup %1220 }
 0xb29   :  { %654 = vrot.lane.b32.xlu2 %v1221_v41, %s1401_s20 }
 0xb31   :  { %83 = vperm.xlu2 %1165, %v62_v42  }
 0xb82   :  { %v632_v43 = vpop.permute.xlu1 %631 }
 0xb83   :  { %v655_v44 = vpop.permute.xlu2 %654  ;;  %v634_v45 = vmul.f32 %v632_v43, %v616_v56 }
 0xb84   :  { %v657_v46 = vmul.f32 %v655_v44, %v639_v57 }
 0xb85   :  { %659 = vrot.lane.b32.xlu0 %v634_v45, %s1399_s17 }
 0xb86   :  { %663 = vrot.lane.b32.xlu1 %v657_v46, %s1401_s20 }
 0xb8b   :  { %v84_v47 = vpop.permute.xlu2 %83 }
 0xb8c   :  { %vm96_vm7 = vcmp.eq.s32.totalorder %v1500_v28, %v84_v47 }
 0xb8d   :  { %1126 = vmatmul.msk.f32.gmra.mxu0 %vm96_vm7, %v1400_v30 }
 0xbf7   :  { %v660_v48 = vpop.permute.xlu0 %659 }
 0xbf8   :  { %v664_v49 = vpop.permute.xlu1 %663 }
 0xbf9   :  { %v666_v50 = vsel %vm208_vm1, %v660_v48, %v664_v49 }
 0xbfa   :  { %1140 = vmatmul.msk.f32.vlgmr.msrb.gmra.mxu1 %vm210_vm2, %v666_v50  ;;  %1141 = vmatmul.msk.f32.vlgmr.msrb.gmra.mxu2 %vm210_vm2, %v666_v50 }
 0xc0a   :  { %v163_v58 = vpop.f32.mrf.mxu0 }
 0xc77   :  { %v687_v59 = vpop.f32.mrf.mxu1 }
 0xc78   :  { %v711_v61 = vadd.f32 %v687_v59, %v163_v58 }
 0xc7a   :  { %1222 = vtanh.f32 %v711_v61  ;;  %v712_v3 = vmul.f32 0.5, %v711_v61  ;;  %v64_v61 = vld [vmem:[%s1819_s0 + $0x38] sm:$0xff]  ;;  %s1402_s0 = smov 96  }
 0xc7d   :  { %v707_v62 = vpop.f32.mrf.mxu2 }
 0xc7e   :  { %v734_v63 = vadd.f32 %v1608_v1, %v707_v62 }
 0xc80   :  { %v1223_v0 = vpop.eup %1222  ;;  %1224 = vtanh.f32 %v734_v63  ;;  %v735_v4 = vmul.f32 0.5, %v734_v63 }
 0xc81   :  { %719 = vrot.lane.b32.xlu0 %v1223_v0, %s1401_s20  ;;  %1226 = vtanh.f32 %v712_v3 }
 0xc82   :  { %1228 = vtanh.f32 %v735_v4 }
 0xc86   :  { %v1225_v2 = vpop.eup %1224 }
 0xc87   :  { %742 = vrot.lane.b32.xlu1 %v1225_v2, %s1401_s20  ;;  %v1227_v5 = vpop.eup %1226 }
 0xc88   :  { %v714_v8 = vmul.f32 0.5, %v1227_v5  ;;  %v1229_v9 = vpop.eup %1228 }
 0xc89   :  { %v737_v13 = vmul.f32 0.5, %v1229_v9 }
 0xc8a   :  { %v715_v11 = vadd.f32 0.5, %v714_v8 }
 0xc8b   :  { %v738_v15 = vadd.f32 0.5, %v737_v13 }
 0xc8c   :  { %v717_v18 = vmul.f32 %v715_v11, %v628_v36 }
 0xc8d   :  { %v740_v27 = vmul.f32 %v738_v15, %v651_v40 }
 0xcf3   :  { %v720_v12 = vpop.permute.xlu0 %719 }
 0xcf4   :  { %v722_v14 = vmul.f32 %v720_v12, %v715_v11 }
 0xcf6   :  { %724 = vrot.lane.b32.xlu2 %v722_v14, %s1399_s17 }
 0xcf9   :  { %v743_v16 = vpop.permute.xlu1 %742 }
 0xcfa   :  { %v745_v17 = vmul.f32 %v743_v16, %v738_v15 }
 0xcfc   :  { %747 = vrot.lane.b32.xlu0 %v745_v17, %s1399_s17 }
 0xd50   :  { %v725_v19 = vpop.permute.xlu2 %724 }
 0xd51   :  { %v727_v20 = vadd.f32 %v725_v19, %v717_v18 }
 0xd53   :  { %1230 = vtanh.f32 %v727_v20 }
 0xd59   :  { %v1231_v21 = vpop.eup %1230 }
 0xd5a   :  { %730 = vrot.lane.b32.xlu1 %v1231_v21, %s1401_s20 }
 0xd6e   :  { %v748_v29 = vpop.permute.xlu0 %747 }
 0xd6f   :  { %v750_v6 = vadd.f32 %v748_v29, %v740_v27 }
 0xd71   :  { %1232 = vtanh.f32 %v750_v6 }
 0xd77   :  { %v1233_v7 = vpop.eup %1232 }
 0xd78   :  { %753 = vrot.lane.b32.xlu2 %v1233_v7, %s1401_s20 }
 0xd80   :  { %86 = vperm.xlu2 %1165, %v63_v10  }
 0xdcc   :  { %v731_v22 = vpop.permute.xlu1 %730 }
 0xdcd   :  { %v733_v23 = vmul.f32 %v731_v22, %v715_v11 }
 0xdcf   :  { %758 = vrot.lane.b32.xlu0 %v733_v23, %s1399_s17 }
 0xdd2   :  { %v754_v51 = vpop.permute.xlu2 %753 }
 0xdd3   :  { %v756_v24 = vmul.f32 %v754_v51, %v738_v15 }
 0xdd5   :  { %762 = vrot.lane.b32.xlu1 %v756_v24, %s1401_s20 }
 0xdda   :  { %v87_v25 = vpop.permute.xlu2 %86 }
 0xddb   :  { %vm97_vm8 = vcmp.eq.s32.totalorder %v1500_v28, %v87_v25 }
 0xddc   :  { %1127 = vmatmul.msk.f32.gmra.mxu0 %vm97_vm8, %v1400_v30 }
 0xe41   :  { %v759_v52 = vpop.permute.xlu0 %758 }
 0xe47   :  { %v763_v26 = vpop.permute.xlu1 %762 }
 0xe48   :  { %v765_v53 = vsel %vm208_vm1, %v759_v52, %v763_v26 }
 0xe49   :  { %1142 = vmatmul.msk.f32.vlgmr.msrb.gmra.mxu3 %vm210_vm2, %v765_v53  ;;  %1143 = vmatmul.msk.f32.vlgmr.msra.gmra.mxu1 %vm210_vm2, %v765_v53 }
 0xe59   :  { %v166_v56 = vpop.f32.mrf.mxu0 }
 0xec6   :  { %v806_v54 = vpop.f32.mrf.mxu1 }
 0xec7   :  { %v833_v55 = vadd.f32 %v1608_v1, %v806_v54 }
 0xec9   :  { %1234 = vtanh.f32 %v833_v55  ;;  %v834_v33 = vmul.f32 0.5, %v833_v55 }
 0xecc   :  { %v786_v57 = vpop.f32.mrf.mxu3 }
 0xecd   :  { %v810_v60 = vadd.f32 %v786_v57, %v166_v56 }
 0xecf   :  { %v1235_v31 = vpop.eup %1234  ;;  %1236 = vtanh.f32 %v810_v60  ;;  %v811_v34 = vmul.f32 0.5, %v810_v60 }
 0xed0   :  { %841 = vrot.lane.b32.xlu1 %v1235_v31, %s1401_s20  ;;  %1238 = vtanh.f32 %v834_v33 }
 0xed1   :  { %1240 = vtanh.f32 %v811_v34 }
 0xed5   :  { %v1237_v32 = vpop.eup %1236 }
 0xed6   :  { %818 = vrot.lane.b32.xlu0 %v1237_v32, %s1401_s20  ;;  %v1239_v35 = vpop.eup %1238 }
 0xed7   :  { %v836_v36 = vmul.f32 0.5, %v1239_v35  ;;  %v1241_v37 = vpop.eup %1240 }
 0xed8   :  { %v813_v40 = vmul.f32 0.5, %v1241_v37 }
 0xed9   :  { %v837_v38 = vadd.f32 0.5, %v836_v36 }
 0xeda   :  { %v814_v42 = vadd.f32 0.5, %v813_v40 }
 0xedb   :  { %v839_v49 = vmul.f32 %v837_v38, %v750_v6 }
 0xedc   :  { %v816_v45 = vmul.f32 %v814_v42, %v727_v20 }
 0xf42   :  { %v842_v39 = vpop.permute.xlu1 %841 }
 0xf43   :  { %v844_v41 = vmul.f32 %v842_v39, %v837_v38 }
 0xf45   :  { %846 = vrot.lane.b32.xlu0 %v844_v41, %s1399_s17 }
 0xf48   :  { %v819_v43 = vpop.permute.xlu0 %818 }
 0xf49   :  { %v821_v44 = vmul.f32 %v819_v43, %v814_v42 }
 0xf4b   :  { %823 = vrot.lane.b32.xlu2 %v821_v44, %s1399_s17 }
 0xfa5   :  { %v824_v46 = vpop.permute.xlu2 %823 }
 0xfa6   :  { %v826_v47 = vadd.f32 %v824_v46, %v816_v45  ;;  %v1032_v46 = vld [vmem:[#allocation3 + $0xa0] sm:$0xff] }
 0xfa7   :  { %1049 = vmatpush.msrb.mxu1 %v1032_v46 }
 0xfa8   :  { %1242 = vtanh.f32 %v826_v47 }
 0xfae   :  { %v1243_v48 = vpop.eup %1242 }
 0xfaf   :  { %829 = vrot.lane.b32.xlu1 %v1243_v48, %s1401_s20  ;;  %v1030_v48 = vld [vmem:[#allocation3 + $0x90] sm:$0xff] }
 0xfb7   :  { %v847_v50 = vpop.permute.xlu0 %846 }
 0xfb8   :  { %v849_v58 = vadd.f32 %v847_v50, %v839_v49  ;;  %v1029_v49 = vld [vmem:[#allocation3 + $0x88] sm:$0xff] }
 0xfba   :  { %1244 = vtanh.f32 %v849_v58 }
 0xfc0   :  { %v1245_v59 = vpop.eup %1244 }
 0xfc1   :  { %852 = vrot.lane.b32.xlu2 %v1245_v59, %s1401_s20 }
 0xfc9   :  { %89 = vperm.xlu2 %1165, %v64_v61  }
0x101b   :  { %v853_v62 = vpop.permute.xlu2 %852 }
0x101c   :  { %v855_v63 = vmul.f32 %v853_v62, %v837_v38  ;;  %v1167_v62 = vld [vmem:[#allocation3 + $0xa8] ss:$0 sm:$0xff] }
0x101e   :  { %861 = vrot.lane.b32.xlu1 %v855_v63, %s1401_s20 }
0x1021   :  { %v830_v0 = vpop.permute.xlu1 %829 }
0x1022   :  { %v832_v2 = vmul.f32 %v830_v0, %v814_v42 }
0x1023   :  { %v90_v3 = vpop.permute.xlu2 %89 }
0x1024   :  { %vm98_vm9 = vcmp.eq.s32.totalorder %v1500_v28, %v90_v3  ;;  %857 = vrot.lane.b32.xlu0 %v832_v2, %s1399_s17 }
0x1025   :  { %1128 = vmatmul.msk.f32.gmra.mxu0 %vm98_vm9, %v1400_v30 }
0x1090   :  { %v862_v4 = vpop.permute.xlu1 %861 }
0x1096   :  { %v858_v5 = vpop.permute.xlu0 %857 }
0x1097   :  { %v864_v8 = vsel %vm208_vm1, %v858_v5, %v862_v4 }
0x1098   :  { %1144 = vmatmul.msk.f32.vlgmr.msra.gmra.mxu2 %vm210_vm2, %v864_v8  ;;  %1145 = vmatmul.msk.f32.vlgmr.msra.gmra.mxu3 %vm210_vm2, %v864_v8 }
0x10a2   :  { %v169_v9 = vpop.f32.mrf.mxu0 }
0x111b   :  { %v885_v11 = vpop.f32.mrf.mxu2  ;;  %v905_v12 = vpop.f32.mrf.mxu3 }
0x111c   :  { %v909_v13 = vadd.f32 %v885_v11, %v169_v9  ;;  %v932_v14 = vadd.f32 %v1608_v1, %v905_v12 }
0x111e   :  { %1246 = vtanh.f32 %v909_v13  ;;  %v910_v30 = vmul.f32 0.5, %v909_v13  ;;  %v933_v16 = vmul.f32 0.5, %v932_v14 }
0x111f   :  { %1248 = vtanh.f32 %v932_v14 }
0x1120   :  { %1250 = vtanh.f32 %v910_v30 }
0x1121   :  { %1252 = vtanh.f32 %v933_v16 }
0x1124   :  { %v1247_v28 = vpop.eup %1246 }
0x1125   :  { %v1249_v15 = vpop.eup %1248  ;;  %917 = vrot.lane.b32.xlu0 %v1247_v28, %s1401_s20 }
0x1126   :  { %940 = vrot.lane.b32.xlu1 %v1249_v15, %s1401_s20  ;;  %v1251_v17 = vpop.eup %1250 }
0x1127   :  { %v1253_v18 = vpop.eup %1252  ;;  %v912_v19 = vmul.f32 0.5, %v1251_v17 }
0x1128   :  { %v935_v20 = vmul.f32 0.5, %v1253_v18 }
0x1129   :  { %v913_v21 = vadd.f32 0.5, %v912_v19 }
0x112a   :  { %v936_v27 = vadd.f32 0.5, %v935_v20 }
0x112b   :  { %v915_v22 = vmul.f32 %v913_v21, %v826_v47  ;;  %v1031_v47 = vld [vmem:[#allocation3 + $0x98] sm:$0xff] }
0x112c   :  { %v938_v25 = vmul.f32 %v936_v27, %v849_v58  ;;  %1050 = vmatpush.msrb.mxu1 %v1031_v47 }
0x112e   :  { %1051 = vmatpush.msrb.mxu1 %v1030_v48 }
0x1130   :  { %1052 = vmatpush.msrb.mxu1 %v1029_v49 }
0x1197   :  { %v918_v29 = vpop.permute.xlu0 %917 }
0x1198   :  { %v941_v6 = vpop.permute.xlu1 %940  ;;  %v920_v7 = vmul.f32 %v918_v29, %v913_v21 }
0x1199   :  { %v943_v10 = vmul.f32 %v941_v6, %v936_v27 }
0x119a   :  { %922 = vrot.lane.b32.xlu2 %v920_v7, %s1399_s17 }
0x119b   :  { %945 = vrot.lane.b32.xlu0 %v943_v10, %s1399_s17 }
0x11f4   :  { %v923_v23 = vpop.permute.xlu2 %922 }
0x11f5   :  { %v925_v51 = vadd.f32 %v923_v23, %v915_v22 }
0x11f7   :  { %1254 = vtanh.f32 %v925_v51 }
0x11fd   :  { %v1255_v24 = vpop.eup %1254 }
0x11fe   :  { %928 = vrot.lane.b32.xlu1 %v1255_v24, %s1401_s20 }
0x120d   :  { %v946_v52 = vpop.permute.xlu0 %945 }
0x120e   :  { %v948_v26 = vadd.f32 %v946_v52, %v938_v25 }
0x1210   :  { %1256 = vtanh.f32 %v948_v26 }
0x1216   :  { %v1257_v53 = vpop.eup %1256 }
0x1217   :  { %951 = vrot.lane.b32.xlu2 %v1257_v53, %s1401_s20 }
0x1270   :  { %v929_v54 = vpop.permute.xlu1 %928 }
0x1271   :  { %v952_v55 = vpop.permute.xlu2 %951  ;;  %v931_v56 = vmul.f32 %v929_v54, %v913_v21 }
0x1272   :  { %v954_v57 = vmul.f32 %v952_v55, %v936_v27 }
0x1273   :  { %956 = vrot.lane.b32.xlu0 %v931_v56, %s1399_s17 }
0x1274   :  { %960 = vrot.lane.b32.xlu1 %v954_v57, %s1401_s20 }
0x12e5   :  { %v957_v60 = vpop.permute.xlu0 %956 }
0x12e6   :  { %1011 = vst.msk [vmem:[#allocation9] sm:$0x3] %vm1010_vm10, %v957_v60  ;;  %v961_v31 = vpop.permute.xlu1 %960 }
0x12e7   :  { %v963_v32 = vsel %vm208_vm1, %v957_v60, %v961_v31 }
0x12e8   :  { %1146 = vmatmul.msk.f32.vlgmr.msrb.gmra.mxu0 %vm210_vm2, %v963_v32 }
0x1365   :  { %v984_v33 = vpop.f32.mrf.mxu0 }
0x1366   :  { %v987_v34 = vadd.f32 %v1608_v1, %v984_v33 }
0x1368   :  { %1258 = vtanh.f32 %v987_v34  ;;  %v988_v36 = vmul.f32 0.5, %v987_v34 }
0x136a   :  { %1260 = vtanh.f32 %v988_v36 }
0x136e   :  { %v1259_v35 = vpop.eup %1258 }
0x136f   :  { %995 = vrot.lane.b32.xlu2 %v1259_v35, %s1401_s20 }
0x1370   :  { %v1261_v37 = vpop.eup %1260 }
0x1371   :  { %v990_v38 = vmul.f32 0.5, %v1261_v37 }
0x1373   :  { %v991_v39 = vadd.f32 0.5, %v990_v38 }
0x1375   :  { %v993_v42 = vmul.f32 %v991_v39, %v948_v26 }
0x13c9   :  { %v996_v40 = vpop.permute.xlu2 %995 }
0x13ca   :  { %v998_v41 = vmul.f32 %v996_v40, %v991_v39 }
0x13cc   :  { %1000 = vrot.lane.b32.xlu0 %v998_v41, %s1399_s17 }
0x13d4   :  { %1019 = vrot.lane.b32.xlu0 %v925_v51, %s1402_s0 }
0x143e   :  { %v1001_v43 = vpop.permute.xlu0 %1000 }
0x143f   :  { %v1003_v44 = vadd.f32 %v1001_v43, %v993_v42 }
0x1441   :  { %1262 = vtanh.f32 %v1003_v44 }
0x1446   :  { %v1020_v1 = vpop.permute.xlu0 %1019 }
0x1447   :  { %v1263_v45 = vpop.eup %1262  ;;  %1022 = vst.msk [vmem:[#allocation11] sm:$0x3] %vm1010_vm10, %v1020_v1 }
0x1448   :  { %1006 = vrot.lane.b32.xlu1 %v1263_v45, %s1401_s20 }
0x1450   :  { %1024 = vrot.lane.b32.xlu1 %v1003_v44, %s1402_s0 }
0x14ba   :  { %v1007_v50 = vpop.permute.xlu1 %1006 }
0x14bb   :  { %v1009_v58 = vmul.f32 %v1007_v50, %v991_v39 }
0x14bd   :  { %1013 = vrot.lane.b32.xlu2 %v1009_v58, %s1399_s17 }
0x14c2   :  { %v1025_v59 = vpop.permute.xlu1 %1024 }
0x14c3   :  { %1028 = vst.msk [vmem:[#allocation11 + $0x2] sm:$0x3] %vm1010_vm10, %v1025_v59 }
0x1517   :  { %v1014_v61 = vpop.permute.xlu2 %1013 }
0x1518   :  { %1017 = vst.msk [vmem:[#allocation9 + $0x2] sm:$0x3] %vm1010_vm10, %v1014_v61  ;;  %1147 = vmatmul.msk.f32.vlgmr.msrb.gmra.mxu1 %vm208_vm1, %v1014_v61 }
0x1519   :  { %1083 = dma.vmem_to_hbm [thread:$0]  %s1076_s3, 64, %s1078_s16, [#allocation10], %s1399_s17, %s1399_s17, %s1404_s18  }
0x151a   :  { %1096 = dma.vmem_to_hbm [thread:$0]  %s1089_s1, 64, %s1091_s21, [#allocation10], %s1399_s17, %s1399_s17, %s1404_s18  }
0x1595   :  { %v1054_v63 = vpop.f32.mrf.mxu1 }
0x1596   :  { %v1055_v0 = vadd.f32 %v1167_v62, %v1054_v63 }
0x1598   :  { %v1057_v2 = vmax.f32 %v1055_v0, 0.0 }
0x159a   :  { %1059 = vst.msk [vmem:[#allocation8] sm:$0x3] %vm1058_vm11, %v1057_v2 }
0x159b   :  { %1070 = dma.vmem_to_hbm [thread:$0]  %s1066_s23, 32, %s1068_s2, [#allocation5]  }
0x159c   :  { %1388 = dma.done.wait [#allocation5], 32  }
0x159d   :  { %1389 = vsyncadd [#allocation5], 4294967264 }
0x159e   :  { %1390 = dma.done.wait [#allocation10], 128  }
0x159f   :  { %1391 = vsyncadd [#allocation10], 4294967168 }
0x15a0   :  { %1109 = vsyncpa [#allocation4], 1 }
0x15a1   :  { %1110 = vsyncpa [#allocation7], 1 }
0x15a2   :  { %1111 = vsyncpa [#allocation5], 1 }
0x15a3   :  { %1112 = vsyncpa [#allocation10], 1 }

</bundles_post_ra>
